<compile_context>
chip_gen: v7x
topology: tpu7x:2x2x1
jax: 0.10.0
libtpu: 0.0.40
codegen_flags: <defaults>
</compile_context>

<pallas_src>
import functools

import jax
import jax.numpy as jnp
from jax.experimental import pallas as pl
from jax.experimental.pallas import tpu as pltpu

# Logical dims (PyTorch module) and lane-padded dims used by the kernel.
IN_DIM, H1, H2, H3, OUT_DIM = 37, 500, 500, 300, 5
H1P, H2P, H3P, OUT_PAD = 512, 512, 384, 128


def _cdiv(a, b):
    return (a + b - 1) // b


def _round_up(n, m):
    return ((n + m - 1) // m) * m


def mlp_kernel(x_ref,
               w1_ref, b1_ref,
               w2_ref, b2_ref,
               w3_ref, b3_ref,
               w4_ref, b4_ref,
               o_ref):
    """Whole forward pass for one (TB, ...) batch tile.

    x_ref : (TB, 37)  f32   -- un-padded features; bf16 cast fused here
    wN    : bf16 (in, out_pad);  b1..b3: bf16 (1, out_pad);  b4: f32 (1, 128)
    o_ref : (TB, 128) bf16  -- lane-dense unmasked store; wrapper slices to 5
    """
    # Layer 1: 37 -> 500 (cols padded to 512).  f32 MXU accumulation.
    x = x_ref[...].astype(jnp.bfloat16)
    h = jnp.dot(x, w1_ref[...], preferred_element_type=jnp.float32)
    # bf16 epilogue (bias + ReLU): ~halves VALU work on v6e/v7x; on v5e the
    # elementwise tail is free filler under the MXU anyway.
    h = jnp.maximum(h.astype(jnp.bfloat16) + b1_ref[...], 0.0)
    # Layer 2: 500 -> 500 (512 -> 512), ReLU.
    h = jnp.dot(h, w2_ref[...], preferred_element_type=jnp.float32)
    h = jnp.maximum(h.astype(jnp.bfloat16) + b2_ref[...], 0.0)
    # Layer 3: 500 -> 300 (512 -> 384), ReLU.
    h = jnp.dot(h, w3_ref[...], preferred_element_type=jnp.float32)
    h = jnp.maximum(h.astype(jnp.bfloat16) + b3_ref[...], 0.0)
    # Layer 4: 300 -> 5 (384 -> 128), no activation.  Bias add in f32, then a
    # lane-dense bf16 store (halves the output HBM stream).
    h = jnp.dot(h, w4_ref[...], preferred_element_type=jnp.float32)
    o_ref[...] = (h + b4_ref[...]).astype(o_ref.dtype)


def init_params(key):
    """Raw f32 params mirroring nn.Linear default init (U[-1/sqrt(fan_in), +]).

    Weights are stored as (in, out) == W.T relative to PyTorch's (out, in).
    Returns a tuple of (w, b) pairs at the *logical* (unpadded) shapes.
    """
    dims = [(IN_DIM, H1), (H1, H2), (H2, H3), (H3, OUT_DIM)]
    raw = []
    for fan_in, fan_out in dims:
        key, kw, kb = jax.random.split(key, 3)
        bound = 1.0 / jnp.sqrt(jnp.float32(fan_in))
        w = jax.random.uniform(kw, (fan_in, fan_out), jnp.float32, -bound, bound)
        b = jax.random.uniform(kb, (fan_out,), jnp.float32, -bound, bound)
        raw.append((w, b))
    return tuple(raw)


def prepare_params(raw_params):
    """Zero-pad to lane-dense shapes.

    Weights -> bf16 (w1 keeps its 37 input rows; hidden dims padded to
    512/512/384/128 columns).  Biases 1-3 -> bf16 (bf16 epilogue); bias 4 f32.
    """
    pads = [(IN_DIM, H1P), (H1P, H2P), (H2P, H3P), (H3P, OUT_PAD)]
    prepared = []
    for li, ((w, b), (rp, cp)) in enumerate(zip(raw_params, pads)):
        wp = jnp.pad(w, ((0, rp - w.shape[0]), (0, cp - w.shape[1])))
        bp = jnp.pad(b.reshape(1, -1), ((0, 0), (0, cp - b.shape[0])))
        prepared.append(wp.astype(jnp.bfloat16))
        prepared.append(bp.astype(jnp.float32 if li == 3 else jnp.bfloat16))
    return tuple(prepared)


@functools.partial(jax.jit, static_argnames=("tb",))
def simple_nn_forward(x, prepared_params, *, tb=1024):
    """x: (B, 37) float32.  prepared_params: output of prepare_params()."""
    B = x.shape[0]

    # Batch tiling: minimize zero-row padding (TB ~= cdiv(B, ntiles), multiple
    # of 16 for clean bf16 sublane tiles) and guarantee >= 2 grid steps for
    # large batches so ("parallel",) can shard over v7x's two TensorCores.
    ntiles = _cdiv(B, tb)
    if ntiles == 1 and B >= 256:
        ntiles = 2
    TB = _round_up(_cdiv(B, ntiles), 16)
    Bp = _round_up(B, TB)
    grid = Bp // TB

    # Only pad trailing batch rows with zeros; the feature pad (37->lane 128)
    # and f32->bf16 cast are fused into the kernel.
    xp = x if Bp == B else jnp.pad(x, ((0, Bp - B), (0, 0)))

    const_map = lambda i: (0, 0)  # weights/biases: same block -> VMEM-resident
    in_specs = [pl.BlockSpec((TB, IN_DIM), lambda i: (i, 0))]
    in_specs += [pl.BlockSpec(p.shape, const_map) for p in prepared_params]

    # Stay well under v7x's 64 MiB VMEM; only raise the scoped limit when TB
    # is pushed past 1024 for large-batch throughput on v5e/v6e.
    vmem_limit = (48 if TB > 1024 else 32) * 1024 * 1024

    # TODO(synk): for pure B~8 latency serving, keep the ~1 MiB of bf16
    # weights VMEM-resident across calls (cross-pallas_call prefetch with
    # SEMAPHORE/VMEM outputs) and single-buffer the constant weight specs
    # (pipeline_mode=pl.Buffered(1)); that path is entirely weight-DMA bound.
    out = pl.pallas_call(
        mlp_kernel,
        out_shape=jax.ShapeDtypeStruct((Bp, OUT_PAD), jnp.bfloat16),
        grid=(grid,),
        in_specs=in_specs,
        out_specs=pl.BlockSpec((TB, OUT_PAD), lambda i: (i, 0)),
        compiler_params=pltpu.CompilerParams(
            dimension_semantics=("parallel",),   # v7x: shard batch over 2 TCs
            vmem_limit_bytes=vmem_limit,
        ),
    )(xp, *prepared_params)

    return out[:B, :OUT_DIM].astype(jnp.float32)


def reference_forward_f32(x, raw_params):
    """Pure-f32 PyTorch-equivalent reference (unpadded)."""
    h = x
    for idx, (w, b) in enumerate(raw_params):
        h = h @ w + b
        if idx < 3:
            h = jnp.maximum(h, 0.0)
    return h


def reference_forward_kernel_path(x, prepared_params):
    """Pure-JAX mirror of the kernel's exact bf16/f32 rounding points."""
    w1, b1, w2, b2, w3, b3, w4, b4 = prepared_params
    h = jnp.dot(x.astype(jnp.bfloat16), w1, preferred_element_type=jnp.float32)
    h = jnp.maximum(h.astype(jnp.bfloat16) + b1, 0.0)
    h = jnp.dot(h, w2, preferred_element_type=jnp.float32)
    h = jnp.maximum(h.astype(jnp.bfloat16) + b2, 0.0)
    h = jnp.dot(h, w3, preferred_element_type=jnp.float32)
    h = jnp.maximum(h.astype(jnp.bfloat16) + b3, 0.0)
    h = jnp.dot(h, w4, preferred_element_type=jnp.float32)
    out_bf16 = (h + b4).astype(jnp.bfloat16)
    return out_bf16[:, :OUT_DIM].astype(jnp.float32)


if __name__ == "__main__":
    key = jax.random.PRNGKey(0)
    key, kx, kx2 = jax.random.split(key, 3)

    raw_params = init_params(key)
    prepared = prepare_params(raw_params)

    # Small latency-style batch (single grid step).
    batch = 8
    x = jax.random.normal(kx, (batch, IN_DIM), jnp.float32)
    out = jax.block_until_ready(simple_nn_forward(x, prepared))
    assert out.shape == (batch, OUT_DIM)

    # Tight check vs. a pure-JAX mirror of the exact bf16/f32 kernel math.
    ref_kernel_path = reference_forward_kernel_path(x, prepared)
    assert jnp.allclose(out, ref_kernel_path, atol=2e-2, rtol=2e-2), (
        jnp.max(jnp.abs(out - ref_kernel_path)))

    # Loose check vs. the full-f32 PyTorch-equivalent forward (bf16 rounding).
    ref_f32 = reference_forward_f32(x, raw_params)
    assert jnp.allclose(out, ref_f32, atol=1e-1, rtol=1e-1), (
        jnp.max(jnp.abs(out - ref_f32)))

    # Larger batch exercising the >=2-grid-step (megacore) + row-padding path.
    batch2 = 300
    x2 = jax.random.normal(kx2, (batch2, IN_DIM), jnp.float32)
    out2 = jax.block_until_ready(simple_nn_forward(x2, prepared))
    assert out2.shape == (batch2, OUT_DIM)
    ref2 = reference_forward_f32(x2, raw_params)
    assert jnp.allclose(out2, ref2, atol=1e-1, rtol=1e-1), (
        jnp.max(jnp.abs(out2 - ref2)))

    print("KERNEL_OK")
</pallas_src>

<mosaic_0001>
module attributes {stable_mosaic.version = 11 : i64} {
  func.func @mlp_kernel(%arg0: i32, %arg1: memref<16x37xf32, #tpu.memory_space<vmem>>, %arg2: memref<37x512xbf16, #tpu.memory_space<vmem>>, %arg3: memref<1x512xbf16, #tpu.memory_space<vmem>>, %arg4: memref<512x512xbf16, #tpu.memory_space<vmem>>, %arg5: memref<1x512xbf16, #tpu.memory_space<vmem>>, %arg6: memref<512x384xbf16, #tpu.memory_space<vmem>>, %arg7: memref<1x384xbf16, #tpu.memory_space<vmem>>, %arg8: memref<384x128xbf16, #tpu.memory_space<vmem>>, %arg9: memref<1x128xf32, #tpu.memory_space<vmem>>, %arg10: memref<16x128xbf16, #tpu.memory_space<vmem>>) attributes {dimension_semantics = [#tpu.dimension_semantics<parallel>], iteration_bounds = array<i64: 1>, scalar_prefetch = 0 : i64, scratch_operands = 0 : i64, tpu.core_type = #tpu.core_type<tc>, window_params = [{transform_indices = @transform_0, window_bounds = array<i64: 16, 37>}, {pipeline_mode = #tpu.pipeline_mode<synchronous>, transform_indices = @transform_1, window_bounds = array<i64: 37, 512>}, {pipeline_mode = #tpu.pipeline_mode<synchronous>, transform_indices = @transform_2, window_bounds = array<i64: 1, 512>}, {pipeline_mode = #tpu.pipeline_mode<synchronous>, transform_indices = @transform_3, window_bounds = array<i64: 512, 512>}, {pipeline_mode = #tpu.pipeline_mode<synchronous>, transform_indices = @transform_4, window_bounds = array<i64: 1, 512>}, {pipeline_mode = #tpu.pipeline_mode<synchronous>, transform_indices = @transform_5, window_bounds = array<i64: 512, 384>}, {pipeline_mode = #tpu.pipeline_mode<synchronous>, transform_indices = @transform_6, window_bounds = array<i64: 1, 384>}, {pipeline_mode = #tpu.pipeline_mode<synchronous>, transform_indices = @transform_7, window_bounds = array<i64: 384, 128>}, {pipeline_mode = #tpu.pipeline_mode<synchronous>, transform_indices = @transform_8, window_bounds = array<i64: 1, 128>}, {transform_indices = @transform_9, window_bounds = array<i64: 16, 128>}]} {
    %c0 = arith.constant 0 : index
    %c0_0 = arith.constant 0 : index
    %0 = vector.load %arg1[%c0, %c0_0] : memref<16x37xf32, #tpu.memory_space<vmem>>, vector<16x37xf32>
    %1 = arith.truncf %0 : vector<16x37xf32> to vector<16x37xbf16>
    %c0_1 = arith.constant 0 : index
    %c0_2 = arith.constant 0 : index
    %2 = vector.load %arg2[%c0_1, %c0_2] : memref<37x512xbf16, #tpu.memory_space<vmem>>, vector<37x512xbf16>
    %cst = arith.constant dense<0.000000e+00> : vector<16x512xf32>
    %3 = tpu.matmul %1, %2, %cst {dimension_numbers = #tpu.dot_dimension_numbers<[1], [0], [0], [1], [0, 0, 1, 1], [], []>} : vector<16x37xbf16>, vector<37x512xbf16>, vector<16x512xf32> -> vector<16x512xf32>
    %4 = arith.truncf %3 : vector<16x512xf32> to vector<16x512xbf16>
    %c0_3 = arith.constant 0 : index
    %c0_4 = arith.constant 0 : index
    %5 = vector.load %arg3[%c0_3, %c0_4] : memref<1x512xbf16, #tpu.memory_space<vmem>>, vector<1x512xbf16>
    %6 = vector.broadcast %5 : vector<1x512xbf16> to vector<16x512xbf16>
    %7 = arith.addf %4, %6 : vector<16x512xbf16>
    %cst_5 = arith.constant 0.000000e+00 : bf16
    %8 = vector.broadcast %cst_5 : bf16 to vector<16x512xbf16>
    %9 = arith.maximumf %7, %8 : vector<16x512xbf16>
    %c0_6 = arith.constant 0 : index
    %c0_7 = arith.constant 0 : index
    %10 = vector.load %arg4[%c0_6, %c0_7] : memref<512x512xbf16, #tpu.memory_space<vmem>>, vector<512x512xbf16>
    %cst_8 = arith.constant dense<0.000000e+00> : vector<16x512xf32>
    %11 = tpu.matmul %9, %10, %cst_8 {dimension_numbers = #tpu.dot_dimension_numbers<[1], [0], [0], [1], [0, 0, 1, 1], [], []>} : vector<16x512xbf16>, vector<512x512xbf16>, vector<16x512xf32> -> vector<16x512xf32>
    %12 = arith.truncf %11 : vector<16x512xf32> to vector<16x512xbf16>
    %c0_9 = arith.constant 0 : index
    %c0_10 = arith.constant 0 : index
    %13 = vector.load %arg5[%c0_9, %c0_10] : memref<1x512xbf16, #tpu.memory_space<vmem>>, vector<1x512xbf16>
    %14 = vector.broadcast %13 : vector<1x512xbf16> to vector<16x512xbf16>
    %15 = arith.addf %12, %14 : vector<16x512xbf16>
    %cst_11 = arith.constant 0.000000e+00 : bf16
    %16 = vector.broadcast %cst_11 : bf16 to vector<16x512xbf16>
    %17 = arith.maximumf %15, %16 : vector<16x512xbf16>
    %c0_12 = arith.constant 0 : index
    %c0_13 = arith.constant 0 : index
    %18 = vector.load %arg6[%c0_12, %c0_13] : memref<512x384xbf16, #tpu.memory_space<vmem>>, vector<512x384xbf16>
    %cst_14 = arith.constant dense<0.000000e+00> : vector<16x384xf32>
    %19 = tpu.matmul %17, %18, %cst_14 {dimension_numbers = #tpu.dot_dimension_numbers<[1], [0], [0], [1], [0, 0, 1, 1], [], []>} : vector<16x512xbf16>, vector<512x384xbf16>, vector<16x384xf32> -> vector<16x384xf32>
    %20 = arith.truncf %19 : vector<16x384xf32> to vector<16x384xbf16>
    %c0_15 = arith.constant 0 : index
    %c0_16 = arith.constant 0 : index
    %21 = vector.load %arg7[%c0_15, %c0_16] : memref<1x384xbf16, #tpu.memory_space<vmem>>, vector<1x384xbf16>
    %22 = vector.broadcast %21 : vector<1x384xbf16> to vector<16x384xbf16>
    %23 = arith.addf %20, %22 : vector<16x384xbf16>
    %cst_17 = arith.constant 0.000000e+00 : bf16
    %24 = vector.broadcast %cst_17 : bf16 to vector<16x384xbf16>
    %25 = arith.maximumf %23, %24 : vector<16x384xbf16>
    %c0_18 = arith.constant 0 : index
    %c0_19 = arith.constant 0 : index
    %26 = vector.load %arg8[%c0_18, %c0_19] : memref<384x128xbf16, #tpu.memory_space<vmem>>, vector<384x128xbf16>
    %cst_20 = arith.constant dense<0.000000e+00> : vector<16x128xf32>
    %27 = tpu.matmul %25, %26, %cst_20 {dimension_numbers = #tpu.dot_dimension_numbers<[1], [0], [0], [1], [0, 0, 1, 1], [], []>} : vector<16x384xbf16>, vector<384x128xbf16>, vector<16x128xf32> -> vector<16x128xf32>
    %c0_21 = arith.constant 0 : index
    %c0_22 = arith.constant 0 : index
    %28 = vector.load %arg9[%c0_21, %c0_22] : memref<1x128xf32, #tpu.memory_space<vmem>>, vector<1x128xf32>
    %29 = vector.broadcast %28 : vector<1x128xf32> to vector<16x128xf32>
    %30 = arith.addf %27, %29 : vector<16x128xf32>
    %31 = arith.truncf %30 : vector<16x128xf32> to vector<16x128xbf16>
    %c0_23 = arith.constant 0 : index
    %c0_24 = arith.constant 0 : index
    %32 = vector.load %arg10[%c0_23, %c0_24] : memref<16x128xbf16, #tpu.memory_space<vmem>>, vector<16x128xbf16>
    tpu.vector_store %arg10[%c0_23, %c0_24], %31 {strides = array<i32>} : memref<16x128xbf16, #tpu.memory_space<vmem>>, vector<16x128xbf16>,
    return
  }
  func.func @transform_0(%arg0: i32) -> (i32, i32) {
    %c0_i32 = arith.constant 0 : i32
    %c0_i32_0 = arith.constant 0 : i32
    return %arg0, %c0_i32 : i32, i32
  }
  func.func @transform_1(%arg0: i32) -> (i32, i32) {
    %c0_i32 = arith.constant 0 : i32
    %c0_i32_0 = arith.constant 0 : i32
    %c0_i32_1 = arith.constant 0 : i32
    return %c0_i32, %c0_i32_0 : i32, i32
  }
  func.func @transform_2(%arg0: i32) -> (i32, i32) {
    %c0_i32 = arith.constant 0 : i32
    %c0_i32_0 = arith.constant 0 : i32
    %c0_i32_1 = arith.constant 0 : i32
    return %c0_i32, %c0_i32_0 : i32, i32
  }
  func.func @transform_3(%arg0: i32) -> (i32, i32) {
    %c0_i32 = arith.constant 0 : i32
    %c0_i32_0 = arith.constant 0 : i32
    %c0_i32_1 = arith.constant 0 : i32
    return %c0_i32, %c0_i32_0 : i32, i32
  }
  func.func @transform_4(%arg0: i32) -> (i32, i32) {
    %c0_i32 = arith.constant 0 : i32
    %c0_i32_0 = arith.constant 0 : i32
    %c0_i32_1 = arith.constant 0 : i32
    return %c0_i32, %c0_i32_0 : i32, i32
  }
  func.func @transform_5(%arg0: i32) -> (i32, i32) {
    %c0_i32 = arith.constant 0 : i32
    %c0_i32_0 = arith.constant 0 : i32
    %c0_i32_1 = arith.constant 0 : i32
    return %c0_i32, %c0_i32_0 : i32, i32
  }
  func.func @transform_6(%arg0: i32) -> (i32, i32) {
    %c0_i32 = arith.constant 0 : i32
    %c0_i32_0 = arith.constant 0 : i32
    %c0_i32_1 = arith.constant 0 : i32
    return %c0_i32, %c0_i32_0 : i32, i32
  }
  func.func @transform_7(%arg0: i32) -> (i32, i32) {
    %c0_i32 = arith.constant 0 : i32
    %c0_i32_0 = arith.constant 0 : i32
    %c0_i32_1 = arith.constant 0 : i32
    return %c0_i32, %c0_i32_0 : i32, i32
  }
  func.func @transform_8(%arg0: i32) -> (i32, i32) {
    %c0_i32 = arith.constant 0 : i32
    %c0_i32_0 = arith.constant 0 : i32
    %c0_i32_1 = arith.constant 0 : i32
    return %c0_i32, %c0_i32_0 : i32, i32
  }
  func.func @transform_9(%arg0: i32) -> (i32, i32) {
    %c0_i32 = arith.constant 0 : i32
    %c0_i32_0 = arith.constant 0 : i32
    return %arg0, %c0_i32 : i32, i32
  }
}

</mosaic_0001>

<bundles_post_ra>
// kernel: simple_nn_forward.1
= control target key start
LH: loop header
LB: loop body
LE: loop exit
PB: predicated region body
PF: predicated region fallthrough
CT: control target
= control target key end

     0   :  { %14 = vsyncpa [#allocation3], 0  ;;  %s3557_s0 = inlined_call_operand.vmem [shape: f32[16,37], index: 0, kind: input, shape index: {}]   ;;  %s3558_s1 = inlined_call_operand.hbm [shape: bf16[37,512], index: 1, kind: input, shape index: {}]   ;;  %s3559_s2 = inlined_call_operand.vmem [shape: bf16[1,512], index: 2, kind: input, shape index: {}]   ;;  %s3560_s3 = inlined_call_operand.hbm [shape: bf16[512,512], index: 3, kind: input, shape index: {}]   ;;  %s3561_s4 = inlined_call_operand.vmem [shape: bf16[1,512], index: 4, kind: input, shape index: {}]   ;;  %s3562_s5 = inlined_call_operand.hbm [shape: bf16[512,384], index: 5, kind: input, shape index: {}]   ;;  %s3563_s6 = inlined_call_operand.vmem [shape: bf16[1,384], index: 6, kind: input, shape index: {}]   ;;  %s3564_s7 = inlined_call_operand.hbm [shape: bf16[384,128], index: 7, kind: input, shape index: {}]   ;;  %s3565_s8 = inlined_call_operand.vmem [shape: f32[1,128], index: 8, kind: input, shape index: {}]   ;;  %s3566_s9 = inlined_call_operand.vmem [shape: bf16[16,128], index: 9, kind: output, shape index: {}]  }
   0x1   :  { %15 = vsyncpa [#allocation5], 0 }
   0x2   :  { %16 = vsyncpa [#allocation8], 0  ;;  %s3341_s30 = smov [#allocation4]   ;;  %s3342_s11 = smov [#allocation2]  }
   0x3   :  { %s38_s10 = sshll.u32 %s3341_s30, 4  ;;  %s24_s12 = sshll.u32 %s3342_s11, 4  ;;  %s39_s10 = int_to_ptr.vmem [resolvable:$true] %s38_s10  ;;  %s3406_s12 = int_to_ptr.vmem [resolvable:$true] %s24_s12 }
   0x4   :  { %s3247_s15 = scalar_lea.hbm %s3560_s3, 16384 }
   0x5   :  { %p3248_p0 = scmp.ne.s32.totalorder %s3560_s3, %s3247_s15  ;;  %p3251_p1 = scmp.lt.u32.totalorder %s3247_s15, %s3560_s3 }
   0x7   :  { %p3253_p2 = pnand %p3251_p1, %p3248_p0 }
   0x9   :  { %3256 = shalt.err (!%p3253_p2)
}
   0xa   :  { %s3257_s20 = scalar_lea.vmem %s39_s10, 16384  ;;  %p3262_p4 = scmp.lt.s32.totalorder %s39_s10, %s39_s10 }
   0xb   :  { %p3258_p3 = scmp.ne.s32.totalorder %s39_s10, %s3257_s20  ;;  %p3263_p5 = scmp.lt.s32.totalorder %s3257_s20, %s3257_s20 }
   0xd   :  { %p3264_p6 = por %p3263_p5, %p3262_p4 }
   0xf   :  { %p3265_p7 = pnand %p3264_p6, %p3258_p3 }
  0x11   :  { %3268 = shalt.err (!%p3265_p7)
}
  0x12   :  { %s3343_s21 = smov 256   ;;  %s3344_s22 = smov 16  }
  0x13   :  { %44 = dma.hbm_to_vmem [thread:$0]  %s3560_s3, 16384, %s39_s10, [#allocation5], %s3343_s21, %s3343_s21, %s3344_s22  }
  0x14   :  { %s3269_s27 = scalar_lea.hbm %s3558_s1, 1280 }
  0x15   :  { %p3270_p8 = scmp.ne.s32.totalorder %s3558_s1, %s3269_s27  ;;  %p3273_p9 = scmp.lt.u32.totalorder %s3269_s27, %s3558_s1 }
  0x17   :  { %p3275_p10 = pnand %p3273_p9, %p3270_p8 }
  0x19   :  { %3278 = shalt.err (!%p3275_p10)
}
  0x1a   :  { %s3279_s13 = scalar_lea.vmem %s3406_s12, 1280  ;;  %p3284_p12 = scmp.lt.s32.totalorder %s3406_s12, %s3406_s12 }
  0x1b   :  { %p3280_p11 = scmp.ne.s32.totalorder %s3406_s12, %s3279_s13  ;;  %p3285_p13 = scmp.lt.s32.totalorder %s3279_s13, %s3279_s13 }
  0x1d   :  { %p3286_p0 = por %p3285_p13, %p3284_p12 }
  0x1f   :  { %p3287_p1 = pnand %p3286_p0, %p3280_p11 }
  0x21   :  { %3290 = shalt.err (!%p3287_p1)
}
  0x22   :  { %30 = dma.hbm_to_vmem [thread:$0]  %s3558_s1, 1280, %s3406_s12, [#allocation3], %s3343_s21, %s3343_s21, %s3344_s22  }
  0x23   :  { %s3345_s14 = smov [#allocation6]   ;;  %s3291_s18 = scalar_lea.hbm %s3562_s5, 12288 }
  0x24   :  { %s52_s15 = sshll.u32 %s3345_s14, 4  ;;  %p3292_p2 = scmp.ne.s32.totalorder %s3562_s5, %s3291_s18  ;;  %s53_s15 = int_to_ptr.vmem [resolvable:$true] %s52_s15 }
  0x25   :  { %p3295_p3 = scmp.lt.u32.totalorder %s3291_s18, %s3562_s5 }
  0x27   :  { %p3297_p4 = pnand %p3295_p3, %p3292_p2 }
  0x29   :  { %3300 = shalt.err (!%p3297_p4)
}
  0x2a   :  { %s3301_s25 = scalar_lea.vmem %s53_s15, 12288  ;;  %p3306_p6 = scmp.lt.s32.totalorder %s53_s15, %s53_s15 }
  0x2b   :  { %p3302_p5 = scmp.ne.s32.totalorder %s53_s15, %s3301_s25  ;;  %p3307_p7 = scmp.lt.s32.totalorder %s3301_s25, %s3301_s25 }
  0x2d   :  { %p3308_p8 = por %p3307_p7, %p3306_p6 }
  0x2f   :  { %p3309_p9 = pnand %p3308_p8, %p3302_p5 }
  0x31   :  { %3312 = shalt.err (!%p3309_p9)
}
  0x32   :  { %s3346_s1 = smov 192   ;;  %s3347_s12 = smov 12  }
  0x33   :  { %58 = dma.hbm_to_vmem [thread:$0]  %s3562_s5, 12288, %s53_s15, [#allocation5], %s3346_s1, %s3346_s1, %s3347_s12  }
  0x34   :  { %s3348_s26 = smov [#allocation7]   ;;  %s3313_s30 = scalar_lea.hbm %s3564_s7, 3072 }
  0x35   :  { %s66_s27 = sshll.u32 %s3348_s26, 4  ;;  %p3314_p10 = scmp.ne.s32.totalorder %s3564_s7, %s3313_s30  ;;  %s67_s27 = int_to_ptr.vmem [resolvable:$true] %s66_s27 }
  0x36   :  { %p3317_p11 = scmp.lt.u32.totalorder %s3313_s30, %s3564_s7 }
  0x38   :  { %p3319_p12 = pnand %p3317_p11, %p3314_p10 }
  0x3a   :  { %3322 = shalt.err (!%p3319_p12)
}
  0x3b   :  { %s3323_s14 = scalar_lea.vmem %s67_s27, 3072  ;;  %p3328_p0 = scmp.lt.s32.totalorder %s67_s27, %s67_s27 }
  0x3c   :  { %p3324_p13 = scmp.ne.s32.totalorder %s67_s27, %s3323_s14  ;;  %p3329_p1 = scmp.lt.s32.totalorder %s3323_s14, %s3323_s14 }
  0x3e   :  { %p3330_p2 = por %p3329_p1, %p3328_p0 }
  0x40   :  { %p3331_p3 = pnand %p3330_p2, %p3324_p13 }
  0x42   :  { %3334 = shalt.err (!%p3331_p3)
}
  0x43   :  { %s3349_s5 = smov 64   ;;  %s3350_s15 = smov 4  }
  0x44   :  { %72 = dma.hbm_to_vmem [thread:$0]  %s3564_s7, 3072, %s67_s27, [#allocation8], %s3349_s5, %s3349_s5, %s3350_s15  }
  0x45   :  { %3335 = dma.done.wait [#allocation3], 1280  }
  0x46   :  { %3336 = vsyncadd [#allocation3], 4294966016 }
  0x47   :  { %3337 = dma.done.wait [#allocation5], 28672  }
  0x48   :  { %3338 = vsyncadd [#allocation5], 4294938624 }
  0x49   :  { %3339 = dma.done.wait [#allocation8], 3072  }
  0x4a   :  { %3340 = vsyncadd [#allocation8], 4294964224  ;;  %v3351_v0 = vmov 0   ;;  %vm155_vm0 = vcmask 1041408   ;;  %vm156_vm1 = vcmask 1042432   ;;  %v3352_v1 = vmov 65535  }
  0x4b   :  { %203 = vmatprep.mubr.bf16.mxu0 %v3351_v0  ;;  %246 = vmatprep.mubr.bf16.mxu1 %v3351_v0  ;;  %v157_v2 = vsel %vm155_vm0, 4294967295, %v3352_v1  ;;  %v2887_v3 = vld [vmem:[#allocation2 + $0x4] ss:$16 sps:$4 sm:$0xff]   ;;  %v2889_v4 = vld [vmem:[#allocation2] ss:$16 sps:$4 sm:$0xff]   ;;  %v89_v18 = vld [vmem:[%s3557_s0 + $0x8] sm:$0xff] }
  0x4c   :  { %171 = vmatprep.subr.bf16.mxu0 %v2887_v3  ;;  %v2890_v5 = vld [vmem:[#allocation2 + $0x24] ss:$16 sps:$4 sm:$0xff]   ;;  %v158_v7 = vsel %vm156_vm1, %v157_v2, 0  ;;  %v2892_v8 = vld [vmem:[#allocation2 + $0x20] ss:$16 sps:$4 sm:$0xff]   ;;  %vm151_vm2 = vcmask 302080  }
  0x4d   :  { %v99_v6 = vld [vmem:[#allocation2 + $0x40] sm:$0x77]  ;;  %172 = vmatpush1.bf16.msra.mxu0 %v2889_v4  ;;  %v2895_v11 = vld [vmem:[#allocation2 + $0xc] ss:$16 sps:$4 sm:$0xff]   ;;  %v2897_v12 = vld [vmem:[#allocation2 + $0x8] ss:$16 sps:$4 sm:$0xff]  }
  0x4e   :  { %v2499_v9 = vcombine.high %v99_v6, %v99_v6  ;;  %v2498_v10 = vcombine.low %v99_v6, %v99_v6  ;;  %173 = vmatprep.subr.bf16.mxu0 %v2890_v5  ;;  %v2898_v14 = vld [vmem:[#allocation2 + $0x2c] ss:$16 sps:$4 sm:$0xff]   ;;  %v88_v15 = vld [vmem:[%s3557_s0] sm:$0xff]  ;;  %214 = vmatprep.subr.bf16.mxu1 %v2895_v11  ;;  %v2900_v19 = vld [vmem:[#allocation2 + $0x28] ss:$16 sps:$4 sm:$0xff]   ;;  %vm3355_vm3 = vmmov 0  }
  0x4f   :  { %v100_v16 = vld [vmem:[#allocation2 + $0x48] sm:$0x77]  ;;  %215 = vmatpush1.bf16.msra.mxu1 %v2897_v12  ;;  %v2905_v22 = vld [vmem:[#allocation4 + $0x4] ss:$16 sps:$4 sm:$0xff]   ;;  %v90_v24 = vpack.c.bf16 %v89_v18, %v88_v15  ;;  %v2903_v26 = vld [vmem:[#allocation4] ss:$16 sps:$4 sm:$0xff]  }
  0x50   :  { %v163_v13 = vand.u32 %v2499_v9, %v158_v7  ;;  %v160_v17 = vand.u32 %v2498_v10, %v158_v7  ;;  %v2501_v20 = vcombine.high %v100_v16, %v100_v16  ;;  %v2500_v21 = vcombine.low %v100_v16, %v100_v16  ;;  %216 = vmatprep.subr.bf16.mxu1 %v2898_v14  ;;  %v2908_v27 = vld [vmem:[#allocation4 + $0xc] ss:$16 sps:$4 sm:$0xff]   ;;  %v2911_v28 = vld [vmem:[#allocation4 + $0x24] ss:$16 sps:$4 sm:$0xff]   ;;  %v2906_v29 = vld [vmem:[#allocation4 + $0x8] ss:$16 sps:$4 sm:$0xff]  }
  0x51   :  { %174 = vmatpush1.bf16.msra.mxu0 %v2892_v8  ;;  %v2909_v30 = vld [vmem:[#allocation4 + $0x20] ss:$16 sps:$4 sm:$0xff]   ;;  %v2914_v31 = vld [vmem:[#allocation4 + $0x2c] ss:$16 sps:$4 sm:$0xff]   ;;  %v2917_v32 = vld [vmem:[#allocation4 + $0x44] ss:$16 sps:$4 sm:$0xff]  }
  0x52   :  { %175 = vmatprep.subr.bf16.mxu0 %v163_v13  ;;  %v169_v23 = vand.u32 %v2501_v20, %v158_v7  ;;  %v166_v25 = vand.u32 %v2500_v21, %v158_v7  ;;  %v2912_v33 = vld [vmem:[#allocation4 + $0x28] ss:$16 sps:$4 sm:$0xff]   ;;  %v2915_v34 = vld [vmem:[#allocation4 + $0x40] ss:$16 sps:$4 sm:$0xff]   ;;  %v2920_v35 = vld [vmem:[#allocation4 + $0x4c] ss:$16 sps:$4 sm:$0xff]  }
  0x53   :  { %217 = vmatpush1.bf16.msra.mxu1 %v2900_v19  ;;  %v2923_v36 = vld [vmem:[#allocation4 + $0x64] ss:$16 sps:$4 sm:$0xff]   ;;  %v2918_v37 = vld [vmem:[#allocation4 + $0x48] ss:$16 sps:$4 sm:$0xff]   ;;  %v2921_v38 = vld [vmem:[#allocation4 + $0x60] ss:$16 sps:$4 sm:$0xff]  }
  0x54   :  { %218 = vmatprep.subr.bf16.mxu1 %v169_v23  ;;  %v2926_v39 = vld [vmem:[#allocation4 + $0x6c] ss:$16 sps:$4 sm:$0xff]   ;;  %v2929_v40 = vld [vmem:[#allocation4 + $0x84] ss:$16 sps:$4 sm:$0xff]   ;;  %v2924_v41 = vld [vmem:[#allocation4 + $0x68] ss:$16 sps:$4 sm:$0xff]  }
  0x55   :  { %176 = vmatpush1.bf16.msra.mxu0 %v160_v17  ;;  %v2927_v42 = vld [vmem:[#allocation4 + $0x80] ss:$16 sps:$4 sm:$0xff]   ;;  %v2932_v43 = vld [vmem:[#allocation4 + $0x8c] ss:$16 sps:$4 sm:$0xff]   ;;  %v2935_v44 = vld [vmem:[#allocation4 + $0xa4] ss:$16 sps:$4 sm:$0xff]  }
  0x56   :  { %1091 = vmatprep.subr.bf16.mxu0 %v2905_v22  ;;  %v2930_v45 = vld [vmem:[#allocation4 + $0x88] ss:$16 sps:$4 sm:$0xff]   ;;  %v2933_v46 = vld [vmem:[#allocation4 + $0xa0] ss:$16 sps:$4 sm:$0xff]   ;;  %v2938_v47 = vld [vmem:[#allocation4 + $0xac] ss:$16 sps:$4 sm:$0xff]  }
  0x57   :  { %219 = vmatpush1.bf16.msra.mxu1 %v166_v25  ;;  %v2941_v48 = vld [vmem:[#allocation4 + $0xc4] ss:$16 sps:$4 sm:$0xff]   ;;  %v2936_v49 = vld [vmem:[#allocation4 + $0xa8] ss:$16 sps:$4 sm:$0xff]   ;;  %v2939_v50 = vld [vmem:[#allocation4 + $0xc0] ss:$16 sps:$4 sm:$0xff]  }
  0x58   :  { %2502 = vmatmul.mubr.msk.bf16.vlgmr.msra.gmra.mrb[0].mxu0 %vm151_vm2, %v90_v24  ;;  %1177 = vmatprep.subr.bf16.mxu1 %v2908_v27  ;;  %v2944_v51 = vld [vmem:[#allocation4 + $0xcc] ss:$16 sps:$4 sm:$0xff]   ;;  %v2947_v52 = vld [vmem:[#allocation4 + $0xe4] ss:$16 sps:$4 sm:$0xff]   ;;  %v2942_v53 = vld [vmem:[#allocation4 + $0xc8] ss:$16 sps:$4 sm:$0xff]  }
  0x59   :  { %1092 = vmatpush1.bf16.msra.mxu0 %v2903_v26  ;;  %v2945_v54 = vld [vmem:[#allocation4 + $0xe0] ss:$16 sps:$4 sm:$0xff]   ;;  %v2950_v55 = vld [vmem:[#allocation4 + $0xec] ss:$16 sps:$4 sm:$0xff]   ;;  %v2953_v56 = vld [vmem:[#allocation4 + $0x104] ss:$16 sps:$4 sm:$0xff]  }
  0x5a   :  { %1093 = vmatprep.subr.bf16.mxu0 %v2911_v28  ;;  %2503 = vmatmul.mubr.msk.bf16.vlgmr.msra.gmra.mrb[0].mxu1 %vm151_vm2, %v90_v24  ;;  %v2948_v57 = vld [vmem:[#allocation4 + $0xe8] ss:$16 sps:$4 sm:$0xff]   ;;  %v2951_v58 = vld [vmem:[#allocation4 + $0x100] ss:$16 sps:$4 sm:$0xff]   ;;  %v2956_v59 = vld [vmem:[#allocation4 + $0x10c] ss:$16 sps:$4 sm:$0xff]  }
  0x5b   :  { %1178 = vmatpush1.bf16.msra.mxu1 %v2906_v29  ;;  %v2959_v60 = vld [vmem:[#allocation4 + $0x124] ss:$16 sps:$4 sm:$0xff]   ;;  %v2954_v61 = vld [vmem:[#allocation4 + $0x108] ss:$16 sps:$4 sm:$0xff]   ;;  %v2957_v62 = vld [vmem:[#allocation4 + $0x120] ss:$16 sps:$4 sm:$0xff]  }
  0x5c   :  { %1179 = vmatprep.subr.bf16.mxu1 %v2914_v31  ;;  %v2962_v63 = vld [vmem:[#allocation4 + $0x12c] ss:$16 sps:$4 sm:$0xff]   ;;  %v2965_v1 = vld [vmem:[#allocation4 + $0x144] ss:$16 sps:$4 sm:$0xff]   ;;  %v2960_v2 = vld [vmem:[#allocation4 + $0x128] ss:$16 sps:$4 sm:$0xff]  }
  0x5d   :  { %1094 = vmatpush1.bf16.msra.mxu0 %v2909_v30  ;;  %v2963_v3 = vld [vmem:[#allocation4 + $0x140] ss:$16 sps:$4 sm:$0xff]   ;;  %v2968_v4 = vld [vmem:[#allocation4 + $0x14c] ss:$16 sps:$4 sm:$0xff]   ;;  %v2971_v5 = vld [vmem:[#allocation4 + $0x164] ss:$16 sps:$4 sm:$0xff]   ;;  %v274_v30 = vlaneseq }
  0x5e   :  { %1095 = vmatprep.subr.bf16.mxu0 %v2917_v32  ;;  %v2966_v6 = vld [vmem:[#allocation4 + $0x148] ss:$16 sps:$4 sm:$0xff]   ;;  %v2969_v7 = vld [vmem:[#allocation4 + $0x160] ss:$16 sps:$4 sm:$0xff]   ;;  %v2974_v8 = vld [vmem:[#allocation4 + $0x16c] ss:$16 sps:$4 sm:$0xff]  }
  0x5f   :  { %1180 = vmatpush1.bf16.msra.mxu1 %v2912_v33  ;;  %v2977_v9 = vld [vmem:[#allocation4 + $0x184] ss:$16 sps:$4 sm:$0xff]   ;;  %v2972_v10 = vld [vmem:[#allocation4 + $0x168] ss:$16 sps:$4 sm:$0xff]   ;;  %v2975_v11 = vld [vmem:[#allocation4 + $0x180] ss:$16 sps:$4 sm:$0xff]  }
  0x60   :  { %1181 = vmatprep.subr.bf16.mxu1 %v2920_v35  ;;  %v2980_v12 = vld [vmem:[#allocation4 + $0x18c] ss:$16 sps:$4 sm:$0xff]   ;;  %v2983_v13 = vld [vmem:[#allocation4 + $0x1a4] ss:$16 sps:$4 sm:$0xff]   ;;  %v2978_v14 = vld [vmem:[#allocation4 + $0x188] ss:$16 sps:$4 sm:$0xff]  }
  0x61   :  { %1096 = vmatpush1.bf16.msra.mxu0 %v2915_v34  ;;  %v2981_v15 = vld [vmem:[#allocation4 + $0x1a0] ss:$16 sps:$4 sm:$0xff]   ;;  %v2986_v16 = vld [vmem:[#allocation4 + $0x1ac] ss:$16 sps:$4 sm:$0xff]   ;;  %v2984_v17 = vld [vmem:[#allocation4 + $0x1a8] ss:$16 sps:$4 sm:$0xff]  }
  0x62   :  { %1097 = vmatprep.subr.bf16.mxu0 %v2923_v36  ;;  %v2989_v18 = vld [vmem:[#allocation4 + $0x1c4] ss:$16 sps:$4 sm:$0xff]   ;;  %v2992_v19 = vld [vmem:[#allocation4 + $0x1cc] ss:$16 sps:$4 sm:$0xff]   ;;  %v2987_v20 = vld [vmem:[#allocation4 + $0x1c0] ss:$16 sps:$4 sm:$0xff]  }
  0x63   :  { %1182 = vmatpush1.bf16.msra.mxu1 %v2918_v37  ;;  %v2990_v21 = vld [vmem:[#allocation4 + $0x1c8] ss:$16 sps:$4 sm:$0xff]   ;;  %v2995_v22 = vld [vmem:[#allocation4 + $0x1e4] ss:$16 sps:$4 sm:$0xff]   ;;  %v2998_v23 = vld [vmem:[#allocation4 + $0x1ec] ss:$16 sps:$4 sm:$0xff]  }
  0x64   :  { %1183 = vmatprep.subr.bf16.mxu1 %v2926_v39  ;;  %v2993_v24 = vld [vmem:[#allocation4 + $0x1e0] ss:$16 sps:$4 sm:$0xff]   ;;  %v2996_v25 = vld [vmem:[#allocation4 + $0x1e8] ss:$16 sps:$4 sm:$0xff]   ;;  %v3001_v26 = vld [vmem:[#allocation4 + $0x204] ss:$16 sps:$4 sm:$0xff]  }
  0x65   :  { %1098 = vmatpush1.bf16.msra.mxu0 %v2921_v38  ;;  %v3004_v27 = vld [vmem:[#allocation4 + $0x20c] ss:$16 sps:$4 sm:$0xff]   ;;  %v3353_v28 = vmov 1966171168   ;;  %v275_v32 = vshrl.u32 %v274_v30, 7 }
  0x66   :  { %1099 = vmatprep.subr.bf16.mxu0 %v2929_v40  ;;  %v272_v29 = vunpack.c.l.s4 %v3353_v28  ;;  %v2504_v33 = vld.sshfl [vmem:[%s3559_s2] sm:$0x33 pattern:$0x75316420]  ;;  %v3046_v28 = vld [vmem:[#allocation4 + $0x2ec] ss:$16 sps:$4 sm:$0xff]  }
  0x67   :  { %1184 = vmatpush1.bf16.msra.mxu1 %v2924_v41  ;;  %v270_v35 = vcombine.high %v2504_v33, %v2504_v33  ;;  %v3482_v39 = vsub.s32 0, %v275_v32  ;;  %v3044_v30 = vld [vmem:[#allocation4 + $0x2e8] ss:$16 sps:$4 sm:$0xff]  }
  0x68   :  { %1185 = vmatprep.subr.bf16.mxu1 %v2932_v43  ;;  %v273_v31 = vunpack.c.0.s8 %v272_v29  ;;  %v3041_v29 = vld [vmem:[#allocation4 + $0x2e0] ss:$16 sps:$4 sm:$0xff]  }
  0x69   :  { %1100 = vmatpush1.bf16.msra.mxu0 %v2927_v42 }
  0x6a   :  { %1101 = vmatprep.subr.bf16.mxu0 %v2935_v44  ;;  %v3474_v34 = vsub.s32 %v273_v31, %v275_v32  ;;  %v3049_v31 = vld [vmem:[#allocation4 + $0x304] ss:$16 sps:$4 sm:$0xff]   ;;  %v3052_v32 = vld [vmem:[#allocation4 + $0x30c] ss:$16 sps:$4 sm:$0xff]  }
  0x6b   :  { %1186 = vmatpush1.bf16.msra.mxu1 %v2930_v45 }
  0x6c   :  { %1187 = vmatprep.subr.bf16.mxu1 %v2938_v47  ;;  %v3477_v36 = vrot.slane %v2504_v33, %v3474_v34  ;;  %v284_v37 = vrot.slane %v270_v35, %v3474_v34  ;;  %v3047_v33 = vld [vmem:[#allocation4 + $0x300] ss:$16 sps:$4 sm:$0xff]   ;;  %v3050_v35 = vld [vmem:[#allocation4 + $0x308] ss:$16 sps:$4 sm:$0xff]  }
  0x6d   :  { %1102 = vmatpush1.bf16.msra.mxu0 %v2933_v46 }
  0x6e   :  { %1103 = vmatprep.subr.bf16.mxu0 %v2941_v48  ;;  %v288_v38 = vpack.i.b16 %v3477_v36, %v3477_v36  ;;  %v295_v40 = vpack.i.b16 %v284_v37, %v284_v37  ;;  %v286_v41 = vcombine.high %v284_v37, %v284_v37  ;;  %v3055_v37 = vld [vmem:[#allocation4 + $0x324] ss:$16 sps:$4 sm:$0xff]  }
  0x6f   :  { %1188 = vmatpush1.bf16.msra.mxu1 %v2936_v49 }
  0x70   :  { %1189 = vmatprep.subr.bf16.mxu1 %v2944_v51  ;;  %v293_v44 = vrot.slane %v288_v38, %v3482_v39  ;;  %v300_v46 = vrot.slane %v295_v40, %v3482_v39  ;;  %v309_v47 = vpack.i.b16 %v286_v41, %v286_v41  ;;  %v3058_v38 = vld [vmem:[#allocation4 + $0x32c] ss:$16 sps:$4 sm:$0xff]   ;;  %v3053_v40 = vld [vmem:[#allocation4 + $0x320] ss:$16 sps:$4 sm:$0xff]   ;;  %v3056_v41 = vld [vmem:[#allocation4 + $0x328] ss:$16 sps:$4 sm:$0xff]  }
  0x71   :  { %1104 = vmatpush1.bf16.msra.mxu0 %v2939_v50 }
  0x72   :  { %1105 = vmatprep.subr.bf16.mxu0 %v2947_v52 }
  0x73   :  { %1190 = vmatpush1.bf16.msra.mxu1 %v2942_v53 }
  0x74   :  { %1191 = vmatprep.subr.bf16.mxu1 %v2950_v55 }
  0x75   :  { %1106 = vmatpush1.bf16.msra.mxu0 %v2945_v54 }
  0x76   :  { %1107 = vmatprep.subr.bf16.mxu0 %v2953_v56  ;;  %v314_v56 = vrot.slane %v309_v47, %v3482_v39  ;;  %v3070_v47 = vld [vmem:[#allocation4 + $0x36c] ss:$16 sps:$4 sm:$0xff]  }
  0x77   :  { %1192 = vmatpush1.bf16.msra.mxu1 %v2948_v57 }
  0x78   :  { %1193 = vmatprep.subr.bf16.mxu1 %v2956_v59 }
  0x79   :  { %1108 = vmatpush1.bf16.msra.mxu0 %v2951_v58 }
  0x7a   :  { %1109 = vmatprep.subr.bf16.mxu0 %v2959_v60  ;;  %v2999_v60 = vld [vmem:[#allocation4 + $0x200] ss:$16 sps:$4 sm:$0xff]  }
  0x7b   :  { %1194 = vmatpush1.bf16.msra.mxu1 %v2954_v61  ;;  %v3002_v61 = vld [vmem:[#allocation4 + $0x208] ss:$16 sps:$4 sm:$0xff]  }
  0x7c   :  { %1195 = vmatprep.subr.bf16.mxu1 %v2962_v63 }
  0x7d   :  { %1110 = vmatpush1.bf16.msra.mxu0 %v2957_v62 }
  0x7e   :  { %1111 = vmatprep.subr.bf16.mxu0 %v2965_v1  ;;  %v3007_v1 = vld [vmem:[#allocation4 + $0x224] ss:$16 sps:$4 sm:$0xff]  }
  0x7f   :  { %1196 = vmatpush1.bf16.msra.mxu1 %v2960_v2  ;;  %v3010_v2 = vld [vmem:[#allocation4 + $0x22c] ss:$16 sps:$4 sm:$0xff]  }
  0x80   :  { %1197 = vmatprep.subr.bf16.mxu1 %v2968_v4  ;;  %v3005_v4 = vld [vmem:[#allocation4 + $0x220] ss:$16 sps:$4 sm:$0xff]  }
  0x81   :  { %1112 = vmatpush1.bf16.msra.mxu0 %v2963_v3 }
  0x82   :  { %1113 = vmatprep.subr.bf16.mxu0 %v2971_v5  ;;  %v3008_v5 = vld [vmem:[#allocation4 + $0x228] ss:$16 sps:$4 sm:$0xff]  }
  0x83   :  { %1198 = vmatpush1.bf16.msra.mxu1 %v2966_v6 }
  0x84   :  { %1199 = vmatprep.subr.bf16.mxu1 %v2974_v8  ;;  %v3016_v8 = vld [vmem:[#allocation4 + $0x24c] ss:$16 sps:$4 sm:$0xff]  }
  0x85   :  { %1114 = vmatpush1.bf16.msra.mxu0 %v2969_v7  ;;  %v3013_v7 = vld [vmem:[#allocation4 + $0x244] ss:$16 sps:$4 sm:$0xff]  }
  0x86   :  { %1115 = vmatprep.subr.bf16.mxu0 %v2977_v9  ;;  %v3011_v9 = vld [vmem:[#allocation4 + $0x240] ss:$16 sps:$4 sm:$0xff]  }
  0x87   :  { %1200 = vmatpush1.bf16.msra.mxu1 %v2972_v10  ;;  %v3014_v10 = vld [vmem:[#allocation4 + $0x248] ss:$16 sps:$4 sm:$0xff]  }
  0x88   :  { %1201 = vmatprep.subr.bf16.mxu1 %v2980_v12  ;;  %v3022_v12 = vld [vmem:[#allocation4 + $0x26c] ss:$16 sps:$4 sm:$0xff]  }
  0x89   :  { %1116 = vmatpush1.bf16.msra.mxu0 %v2975_v11  ;;  %v3019_v11 = vld [vmem:[#allocation4 + $0x264] ss:$16 sps:$4 sm:$0xff]  }
  0x8a   :  { %1117 = vmatprep.subr.bf16.mxu0 %v2983_v13  ;;  %v3017_v13 = vld [vmem:[#allocation4 + $0x260] ss:$16 sps:$4 sm:$0xff]  }
  0x8b   :  { %1202 = vmatpush1.bf16.msra.mxu1 %v2978_v14  ;;  %v3020_v14 = vld [vmem:[#allocation4 + $0x268] ss:$16 sps:$4 sm:$0xff]  }
  0x8c   :  { %1203 = vmatprep.subr.bf16.mxu1 %v2986_v16  ;;  %v3028_v16 = vld [vmem:[#allocation4 + $0x28c] ss:$16 sps:$4 sm:$0xff]  }
  0x8d   :  { %1118 = vmatpush1.bf16.msra.mxu0 %v2981_v15  ;;  %v3025_v15 = vld [vmem:[#allocation4 + $0x284] ss:$16 sps:$4 sm:$0xff]  }
  0x8e   :  { %1119 = vmatprep.subr.bf16.mxu0 %v2989_v18  ;;  %v3026_v18 = vld [vmem:[#allocation4 + $0x288] ss:$16 sps:$4 sm:$0xff]  }
  0x8f   :  { %1204 = vmatpush1.bf16.msra.mxu1 %v2984_v17  ;;  %v3023_v17 = vld [vmem:[#allocation4 + $0x280] ss:$16 sps:$4 sm:$0xff]  }
  0x90   :  { %1205 = vmatprep.subr.bf16.mxu1 %v2992_v19  ;;  %v3031_v19 = vld [vmem:[#allocation4 + $0x2a4] ss:$16 sps:$4 sm:$0xff]  }
  0x91   :  { %1120 = vmatpush1.bf16.msra.mxu0 %v2987_v20  ;;  %v3034_v20 = vld [vmem:[#allocation4 + $0x2ac] ss:$16 sps:$4 sm:$0xff]  }
  0x92   :  { %1121 = vmatprep.subr.bf16.mxu0 %v2995_v22  ;;  %v3032_v22 = vld [vmem:[#allocation4 + $0x2a8] ss:$16 sps:$4 sm:$0xff]  }
  0x93   :  { %1206 = vmatpush1.bf16.msra.mxu1 %v2990_v21  ;;  %v3029_v21 = vld [vmem:[#allocation4 + $0x2a0] ss:$16 sps:$4 sm:$0xff]  }
  0x94   :  { %1207 = vmatprep.subr.bf16.mxu1 %v2998_v23  ;;  %v3037_v23 = vld [vmem:[#allocation4 + $0x2c4] ss:$16 sps:$4 sm:$0xff]  }
  0x95   :  { %1122 = vmatpush1.bf16.msra.mxu0 %v2993_v24  ;;  %v3040_v24 = vld [vmem:[#allocation4 + $0x2cc] ss:$16 sps:$4 sm:$0xff]  }
  0x96   :  { %1134 = vmatprep.subr.bf16.mxu0 %v3001_v26  ;;  %v3038_v26 = vld [vmem:[#allocation4 + $0x2c8] ss:$16 sps:$4 sm:$0xff]  }
  0x97   :  { %1208 = vmatpush1.bf16.msra.mxu1 %v2996_v25  ;;  %v3035_v25 = vld [vmem:[#allocation4 + $0x2c0] ss:$16 sps:$4 sm:$0xff]  }
  0x98   :  { %1220 = vmatprep.subr.bf16.mxu1 %v3004_v27  ;;  %v3043_v27 = vld [vmem:[#allocation4 + $0x2e4] ss:$16 sps:$4 sm:$0xff]  }
 0x12b   :  { %v205_v42 = vpop.f32.mrb[0].mxu0 }
 0x12c   :  { %v207_v43 = vpop.f32.mrb[1].mxu0 }
 0x12d   :  { %v209_v45 = vpop.f32.mrb[2].mxu0  ;;  %v3486_v51 = vpop.f32.mrb[0].mxu1 }
 0x12e   :  { %v257_v48 = vpack.c.bf16 %v209_v45, %v205_v42  ;;  %v211_v49 = vpop.f32.mrb[3].mxu0  ;;  %v250_v53 = vpop.f32.mrb[1].mxu1  ;;  %v3061_v42 = vld [vmem:[#allocation4 + $0x344] ss:$16 sps:$4 sm:$0xff]   ;;  %v3062_v45 = vld [vmem:[#allocation4 + $0x348] ss:$16 sps:$4 sm:$0xff]  }
 0x12f   :  { %v258_v50 = vpack.c.bf16 %v211_v49, %v207_v43  ;;  %v3488_v55 = vpop.f32.mrb[2].mxu1  ;;  %v3064_v43 = vld [vmem:[#allocation4 + $0x34c] ss:$16 sps:$4 sm:$0xff]   ;;  %v3068_v49 = vld [vmem:[#allocation4 + $0x368] ss:$16 sps:$4 sm:$0xff]  }
 0x130   :  { %v315_v52 = vadd.bf16 %v293_v44, %v257_v48  ;;  %v259_v57 = vpack.c.bf16 %v3488_v55, %v3486_v51  ;;  %v254_v58 = vpop.f32.mrb[3].mxu1  ;;  %v3059_v44 = vld [vmem:[#allocation4 + $0x340] ss:$16 sps:$4 sm:$0xff]  }
 0x131   :  { %v316_v54 = vadd.bf16 %v300_v46, %v258_v50  ;;  %v260_v62 = vpack.c.bf16 %v254_v58, %v250_v53  ;;  %v3067_v46 = vld [vmem:[#allocation4 + $0x364] ss:$16 sps:$4 sm:$0xff]   ;;  %v3065_v48 = vld [vmem:[#allocation4 + $0x360] ss:$16 sps:$4 sm:$0xff]  }
 0x132   :  { %v319_v63 = vmax.bf16 %v3351_v0, %v315_v52  ;;  %v3073_v50 = vld [vmem:[#allocation4 + $0x384] ss:$16 sps:$4 sm:$0xff]   ;;  %v3076_v52 = vld [vmem:[#allocation4 + $0x38c] ss:$16 sps:$4 sm:$0xff]   ;;  %v3071_v53 = vld [vmem:[#allocation4 + $0x380] ss:$16 sps:$4 sm:$0xff]  }
 0x133   :  { %v320_v59 = vmax.bf16 %v3351_v0, %v316_v54  ;;  %v318_v3 = vadd.bf16 %v314_v56, %v260_v62  ;;  %v3074_v54 = vld [vmem:[#allocation4 + $0x388] ss:$16 sps:$4 sm:$0xff]   ;;  %v285_v56 = vcombine.high %v3477_v36, %v3477_v36  ;;  %v3079_v58 = vld [vmem:[#allocation4 + $0x3a4] ss:$16 sps:$4 sm:$0xff]   ;;  %v3128_v51 = vld [vmem:[#allocation6 + $0x20] ss:$12 sps:$4 sm:$0xff]  }
 0x134   :  { %v3091_v36 = vld [vmem:[#allocation4 + $0x3e4] ss:$16 sps:$4 sm:$0xff]  }
 0x135   :  { %1123 = vmatprep.mubr.bf16.mxu0 %v320_v59  ;;  %1209 = vmatprep.mubr.bf16.mxu1 %v320_v59  ;;  %v322_v6 = vmax.bf16 %v3351_v0, %v318_v3  ;;  %v3082_v59 = vld [vmem:[#allocation4 + $0x3ac] ss:$16 sps:$4 sm:$0xff]   ;;  %v302_v62 = vpack.i.b16 %v285_v56, %v285_v56  ;;  %v3086_v3 = vld [vmem:[#allocation4 + $0x3c8] ss:$16 sps:$4 sm:$0xff]   ;;  %v3103_v55 = vld [vmem:[#allocation6 + $0x34] ss:$12 sps:$4 sm:$0xff]  }
 0x136   :  { %1124 = vmatmul.mubr.bf16.vlgmr.msra.gmra.mrb[4].mxu0 %v319_v63  ;;  %1210 = vmatmul.mubr.bf16.vlgmr.msra.gmra.mrb[4].mxu1 %v319_v63  ;;  %v3085_v63 = vld [vmem:[#allocation4 + $0x3c4] ss:$16 sps:$4 sm:$0xff]   ;;  %v3156_v56 = vld [vmem:[#allocation6 + $0x16c] ss:$12 sps:$4 sm:$0xff]  }
 0x137   :  { %1135 = vmatpush1.bf16.msra.mxu0 %v2999_v60  ;;  %1221 = vmatpush1.bf16.msra.mxu1 %v3002_v61  ;;  %v3077_v60 = vld [vmem:[#allocation4 + $0x3a0] ss:$16 sps:$4 sm:$0xff]   ;;  %v3080_v61 = vld [vmem:[#allocation4 + $0x3a8] ss:$16 sps:$4 sm:$0xff]  }
 0x138   :  { %1136 = vmatprep.subr.bf16.mxu0 %v3007_v1  ;;  %1222 = vmatprep.subr.bf16.mxu1 %v3010_v2  ;;  %v3088_v1 = vld [vmem:[#allocation4 + $0x3cc] ss:$16 sps:$4 sm:$0xff]   ;;  %v3083_v2 = vld [vmem:[#allocation4 + $0x3c0] ss:$16 sps:$4 sm:$0xff]  }
 0x139   :  { %1166 = vmatprep.mubr.bf16.mxu0 %v322_v6  ;;  %1252 = vmatprep.mubr.bf16.mxu1 %v322_v6  ;;  %v3089_v6 = vld [vmem:[#allocation4 + $0x3e0] ss:$16 sps:$4 sm:$0xff]  }
 0x13b   :  { %1137 = vmatpush1.bf16.msra.mxu0 %v3005_v4  ;;  %1223 = vmatpush1.bf16.msra.mxu1 %v3008_v5  ;;  %v307_v4 = vrot.slane %v302_v62, %v3482_v39  ;;  %v3094_v5 = vld [vmem:[#allocation4 + $0x3ec] ss:$16 sps:$4 sm:$0xff]   ;;  %v3162_v62 = vld [vmem:[#allocation6 + $0x248] ss:$12 sps:$4 sm:$0xff]  }
 0x13c   :  { %1138 = vmatprep.subr.bf16.mxu0 %v3013_v7  ;;  %1224 = vmatprep.subr.bf16.mxu1 %v3016_v8  ;;  %v3092_v7 = vld [vmem:[#allocation4 + $0x3e8] ss:$16 sps:$4 sm:$0xff]  }
 0x13d   :  { %v317_v8 = vadd.bf16 %v307_v4, %v259_v57  ;;  %v3132_v57 = vld [vmem:[#allocation6 + $0xf8] ss:$12 sps:$4 sm:$0xff]  }
 0x13f   :  { %1139 = vmatpush1.bf16.msra.mxu0 %v3011_v9  ;;  %1225 = vmatpush1.bf16.msra.mxu1 %v3014_v10  ;;  %v3097_v9 = vld [vmem:[#allocation6 + $0x4] ss:$12 sps:$4 sm:$0xff]   ;;  %v3122_v10 = vld [vmem:[#allocation6 + $0xc8] ss:$12 sps:$4 sm:$0xff]  }
 0x140   :  { %1140 = vmatprep.subr.bf16.mxu0 %v3019_v11  ;;  %1226 = vmatprep.subr.bf16.mxu1 %v3022_v12  ;;  %v3095_v11 = vld [vmem:[#allocation6] ss:$12 sps:$4 sm:$0xff]   ;;  %v3123_v12 = vld [vmem:[#allocation6 + $0x8] ss:$12 sps:$4 sm:$0xff]  }
 0x143   :  { %1141 = vmatpush1.bf16.msra.mxu0 %v3017_v13  ;;  %1227 = vmatpush1.bf16.msra.mxu1 %v3020_v14  ;;  %v321_v13 = vmax.bf16 %v3351_v0, %v317_v8  ;;  %v3100_v14 = vld [vmem:[#allocation6 + $0x1c] ss:$12 sps:$4 sm:$0xff]  }
 0x144   :  { %1142 = vmatprep.subr.bf16.mxu0 %v3025_v15  ;;  %1228 = vmatprep.subr.bf16.mxu1 %v3028_v16  ;;  %v3127_v15 = vld [vmem:[#allocation6 + $0xe0] ss:$12 sps:$4 sm:$0xff]   ;;  %v3098_v16 = vld [vmem:[#allocation6 + $0x18] ss:$12 sps:$4 sm:$0xff]  }
 0x147   :  { %1143 = vmatpush1.bf16.msra.mxu0 %v3023_v17  ;;  %1229 = vmatpush1.bf16.msra.mxu1 %v3026_v18  ;;  %v3101_v17 = vld [vmem:[#allocation6 + $0x30] ss:$12 sps:$4 sm:$0xff]   ;;  %v3133_v18 = vld [vmem:[#allocation6 + $0x38] ss:$12 sps:$4 sm:$0xff]  }
 0x148   :  { %1144 = vmatprep.subr.bf16.mxu0 %v3031_v19  ;;  %1230 = vmatprep.subr.bf16.mxu1 %v3034_v20  ;;  %v3106_v19 = vld [vmem:[#allocation6 + $0x4c] ss:$12 sps:$4 sm:$0xff]   ;;  %v3137_v20 = vld [vmem:[#allocation6 + $0x110] ss:$12 sps:$4 sm:$0xff]  }
 0x14b   :  { %1145 = vmatpush1.bf16.msra.mxu0 %v3029_v21  ;;  %1231 = vmatpush1.bf16.msra.mxu1 %v3032_v22  ;;  %v3104_v21 = vld [vmem:[#allocation6 + $0x48] ss:$12 sps:$4 sm:$0xff]   ;;  %v3138_v22 = vld [vmem:[#allocation6 + $0x50] ss:$12 sps:$4 sm:$0xff]  }
 0x14c   :  { %1146 = vmatprep.subr.bf16.mxu0 %v3037_v23  ;;  %1232 = vmatprep.subr.bf16.mxu1 %v3040_v24  ;;  %v3109_v23 = vld [vmem:[#allocation6 + $0x64] ss:$12 sps:$4 sm:$0xff]   ;;  %v3142_v24 = vld [vmem:[#allocation6 + $0x128] ss:$12 sps:$4 sm:$0xff]  }
 0x14f   :  { %1147 = vmatpush1.bf16.msra.mxu0 %v3035_v25  ;;  %1233 = vmatpush1.bf16.msra.mxu1 %v3038_v26  ;;  %v3107_v25 = vld [vmem:[#allocation6 + $0x60] ss:$12 sps:$4 sm:$0xff]   ;;  %v3143_v26 = vld [vmem:[#allocation6 + $0x68] ss:$12 sps:$4 sm:$0xff]  }
 0x150   :  { %1148 = vmatprep.subr.bf16.mxu0 %v3043_v27  ;;  %1234 = vmatprep.subr.bf16.mxu1 %v3046_v28  ;;  %v3112_v27 = vld [vmem:[#allocation6 + $0x7c] ss:$12 sps:$4 sm:$0xff]   ;;  %v3147_v28 = vld [vmem:[#allocation6 + $0x140] ss:$12 sps:$4 sm:$0xff]  }
 0x153   :  { %1149 = vmatpush1.bf16.msra.mxu0 %v3041_v29  ;;  %1235 = vmatpush1.bf16.msra.mxu1 %v3044_v30  ;;  %v3110_v29 = vld [vmem:[#allocation6 + $0x78] ss:$12 sps:$4 sm:$0xff]   ;;  %v3148_v30 = vld [vmem:[#allocation6 + $0x80] ss:$12 sps:$4 sm:$0xff]  }
 0x154   :  { %1150 = vmatprep.subr.bf16.mxu0 %v3049_v31  ;;  %1236 = vmatprep.subr.bf16.mxu1 %v3052_v32  ;;  %v3115_v31 = vld [vmem:[#allocation6 + $0x94] ss:$12 sps:$4 sm:$0xff]   ;;  %v3113_v32 = vld [vmem:[#allocation6 + $0x90] ss:$12 sps:$4 sm:$0xff]  }
 0x157   :  { %1151 = vmatpush1.bf16.msra.mxu0 %v3047_v33  ;;  %1237 = vmatpush1.bf16.msra.mxu1 %v3050_v35  ;;  %v3118_v33 = vld [vmem:[#allocation6 + $0xac] ss:$12 sps:$4 sm:$0xff]   ;;  %v3116_v35 = vld [vmem:[#allocation6 + $0xa8] ss:$12 sps:$4 sm:$0xff]  }
 0x158   :  { %1152 = vmatprep.subr.bf16.mxu0 %v3055_v37  ;;  %1238 = vmatprep.subr.bf16.mxu1 %v3058_v38  ;;  %v3121_v37 = vld [vmem:[#allocation6 + $0xc4] ss:$12 sps:$4 sm:$0xff]   ;;  %v3119_v38 = vld [vmem:[#allocation6 + $0xc0] ss:$12 sps:$4 sm:$0xff]  }
 0x15b   :  { %1153 = vmatpush1.bf16.msra.mxu0 %v3053_v40  ;;  %1239 = vmatpush1.bf16.msra.mxu1 %v3056_v41  ;;  %v3126_v40 = vld [vmem:[#allocation6 + $0xdc] ss:$12 sps:$4 sm:$0xff]   ;;  %v3124_v41 = vld [vmem:[#allocation6 + $0xd8] ss:$12 sps:$4 sm:$0xff]  }
 0x15c   :  { %1154 = vmatprep.subr.bf16.mxu0 %v3061_v42  ;;  %1240 = vmatprep.subr.bf16.mxu1 %v3064_v43  ;;  %v3131_v42 = vld [vmem:[#allocation6 + $0xf4] ss:$12 sps:$4 sm:$0xff]   ;;  %v3129_v43 = vld [vmem:[#allocation6 + $0xf0] ss:$12 sps:$4 sm:$0xff]  }
 0x15f   :  { %1155 = vmatpush1.bf16.msra.mxu0 %v3059_v44  ;;  %1241 = vmatpush1.bf16.msra.mxu1 %v3062_v45  ;;  %v3136_v44 = vld [vmem:[#allocation6 + $0x10c] ss:$12 sps:$4 sm:$0xff]   ;;  %v3134_v45 = vld [vmem:[#allocation6 + $0x108] ss:$12 sps:$4 sm:$0xff]  }
 0x160   :  { %1156 = vmatprep.subr.bf16.mxu0 %v3067_v46  ;;  %1242 = vmatprep.subr.bf16.mxu1 %v3070_v47  ;;  %v3141_v46 = vld [vmem:[#allocation6 + $0x124] ss:$12 sps:$4 sm:$0xff]   ;;  %v3139_v47 = vld [vmem:[#allocation6 + $0x120] ss:$12 sps:$4 sm:$0xff]  }
 0x163   :  { %1157 = vmatpush1.bf16.msra.mxu0 %v3065_v48  ;;  %1243 = vmatpush1.bf16.msra.mxu1 %v3068_v49  ;;  %v3146_v48 = vld [vmem:[#allocation6 + $0x13c] ss:$12 sps:$4 sm:$0xff]   ;;  %v3144_v49 = vld [vmem:[#allocation6 + $0x138] ss:$12 sps:$4 sm:$0xff]  }
 0x164   :  { %1158 = vmatprep.subr.bf16.mxu0 %v3073_v50  ;;  %1244 = vmatprep.subr.bf16.mxu1 %v3076_v52  ;;  %v3151_v50 = vld [vmem:[#allocation6 + $0x154] ss:$12 sps:$4 sm:$0xff]   ;;  %v3152_v52 = vld [vmem:[#allocation6 + $0x158] ss:$12 sps:$4 sm:$0xff]  }
 0x167   :  { %1159 = vmatpush1.bf16.msra.mxu0 %v3071_v53  ;;  %1245 = vmatpush1.bf16.msra.mxu1 %v3074_v54  ;;  %v3149_v53 = vld [vmem:[#allocation6 + $0x150] ss:$12 sps:$4 sm:$0xff]   ;;  %v3153_v54 = vld [vmem:[#allocation6 + $0x98] ss:$12 sps:$4 sm:$0xff]  }
 0x168   :  { %1160 = vmatprep.subr.bf16.mxu0 %v3079_v58  ;;  %1246 = vmatprep.subr.bf16.mxu1 %v3082_v59  ;;  %v3157_v58 = vld [vmem:[#allocation6 + $0x170] ss:$12 sps:$4 sm:$0xff]   ;;  %v3154_v59 = vld [vmem:[#allocation6 + $0x168] ss:$12 sps:$4 sm:$0xff]  }
 0x16b   :  { %1161 = vmatpush1.bf16.msra.mxu0 %v3077_v60  ;;  %1247 = vmatpush1.bf16.msra.mxu1 %v3080_v61  ;;  %v3158_v60 = vld [vmem:[#allocation6 + $0xb0] ss:$12 sps:$4 sm:$0xff]  }
 0x16c   :  { %1162 = vmatprep.subr.bf16.mxu0 %v3085_v63  ;;  %1248 = vmatprep.subr.bf16.mxu1 %v3088_v1  ;;  %v3161_v61 = vld [vmem:[#allocation6 + $0x184] ss:$12 sps:$4 sm:$0xff]  }
 0x16d   :  { %v2633_v63 = vld.sshfl [vmem:[%s3561_s4] sm:$0x33 pattern:$0x75316420] }
 0x16e   :  { %v1276_v1 = vcombine.high %v2633_v63, %v2633_v63 }
 0x16f   :  { %1163 = vmatpush1.bf16.msra.mxu0 %v3083_v2  ;;  %1249 = vmatpush1.bf16.msra.mxu1 %v3086_v3  ;;  %v3508_v3 = vrot.slane %v2633_v63, %v3474_v34  ;;  %v3198_v63 = vld [vmem:[#allocation6 + $0x230] ss:$12 sps:$4 sm:$0xff]  }
 0x170   :  { %1164 = vmatprep.subr.bf16.mxu0 %v3091_v36  ;;  %1250 = vmatprep.subr.bf16.mxu1 %v3094_v5  ;;  %v1290_v2 = vrot.slane %v1276_v1, %v3474_v34 }
 0x171   :  { %v1294_v36 = vpack.i.b16 %v3508_v3, %v3508_v3 }
 0x172   :  { %v1292_v4 = vcombine.high %v1290_v2, %v1290_v2  ;;  %v1301_v5 = vpack.i.b16 %v1290_v2, %v1290_v2  ;;  %v3201_v2 = vld [vmem:[#allocation6 + $0x244] ss:$12 sps:$4 sm:$0xff]  }
 0x173   :  { %1165 = vmatpush1.bf16.msra.mxu0 %v3089_v6  ;;  %1251 = vmatpush1.bf16.msra.mxu1 %v3092_v7 }
 0x174   :  { %1969 = vmatprep.subr.bf16.mxu0 %v3097_v9  ;;  %2765 = vmatprep.subr.bf16.mxu1 %v3122_v10  ;;  %v1315_v6 = vpack.i.b16 %v1292_v4, %v1292_v4 }
 0x176   :  { %1167 = vmatmul.mubr.bf16.vlgmr.msra.gmra.mrb[4].mxu0 %v321_v13  ;;  %1253 = vmatmul.mubr.bf16.vlgmr.msra.gmra.mrb[4].mxu1 %v321_v13 }
 0x177   :  { %1970 = vmatpush1.bf16.msra.mxu0 %v3095_v11  ;;  %2766 = vmatpush3.bf16.msra.mxu1 %v3123_v12  ;;  %v1299_v11 = vrot.slane %v1294_v36, %v3482_v39  ;;  %v3204_v36 = vld [vmem:[#allocation6 + $0x25c] ss:$12 sps:$4 sm:$0xff]  }
 0x178   :  { %1971 = vmatprep.subr.bf16.mxu0 %v3100_v14  ;;  %2767 = vmatprep.subr.bf16.mxu1 %v3127_v15  ;;  %v1306_v14 = vrot.slane %v1301_v5, %v3482_v39  ;;  %v3202_v5 = vld [vmem:[#allocation6 + $0x258] ss:$12 sps:$4 sm:$0xff]  }
 0x17b   :  { %1972 = vmatpush1.bf16.msra.mxu0 %v3098_v16  ;;  %2768 = vmatpush3.bf16.msra.mxu1 %v3128_v51 }
 0x17c   :  { %1973 = vmatprep.subr.bf16.mxu0 %v3103_v55  ;;  %2769 = vmatprep.subr.bf16.mxu1 %v3132_v57  ;;  %v1320_v57 = vrot.slane %v1315_v6, %v3482_v39  ;;  %v3207_v6 = vld [vmem:[#allocation6 + $0x274] ss:$12 sps:$4 sm:$0xff]  }
 0x17f   :  { %1974 = vmatpush1.bf16.msra.mxu0 %v3101_v17  ;;  %2770 = vmatpush3.bf16.msra.mxu1 %v3133_v18 }
 0x180   :  { %1975 = vmatprep.subr.bf16.mxu0 %v3106_v19  ;;  %2771 = vmatprep.subr.bf16.mxu1 %v3137_v20 }
 0x183   :  { %1976 = vmatpush1.bf16.msra.mxu0 %v3104_v21  ;;  %2772 = vmatpush3.bf16.msra.mxu1 %v3138_v22 }
 0x184   :  { %1977 = vmatprep.subr.bf16.mxu0 %v3109_v23  ;;  %2773 = vmatprep.subr.bf16.mxu1 %v3142_v24  ;;  %v3159_v23 = vld [vmem:[#allocation6 + $0x180] ss:$12 sps:$4 sm:$0xff]   ;;  %v3163_v24 = vld [vmem:[#allocation6 + $0x188] ss:$12 sps:$4 sm:$0xff]  }
 0x187   :  { %1978 = vmatpush1.bf16.msra.mxu0 %v3107_v25  ;;  %2774 = vmatpush3.bf16.msra.mxu1 %v3143_v26  ;;  %v3166_v26 = vld [vmem:[#allocation6 + $0x19c] ss:$12 sps:$4 sm:$0xff]  }
 0x188   :  { %1979 = vmatprep.subr.bf16.mxu0 %v3112_v27  ;;  %2775 = vmatprep.subr.bf16.mxu1 %v3147_v28  ;;  %v3167_v27 = vld [vmem:[#allocation6 + $0x260] ss:$12 sps:$4 sm:$0xff]  }
 0x18b   :  { %1980 = vmatpush1.bf16.msra.mxu0 %v3110_v29  ;;  %2776 = vmatpush3.bf16.msra.mxu1 %v3148_v30  ;;  %v3164_v29 = vld [vmem:[#allocation6 + $0x198] ss:$12 sps:$4 sm:$0xff]   ;;  %v3168_v30 = vld [vmem:[#allocation6 + $0x1a0] ss:$12 sps:$4 sm:$0xff]  }
 0x18c   :  { %1981 = vmatprep.subr.bf16.mxu0 %v3115_v31  ;;  %2777 = vmatprep.subr.bf16.mxu1 %v3152_v52  ;;  %v3171_v31 = vld [vmem:[#allocation6 + $0x1b4] ss:$12 sps:$4 sm:$0xff]  }
 0x18f   :  { %1982 = vmatpush1.bf16.msra.mxu0 %v3113_v32  ;;  %2778 = vmatpush3.bf16.msra.mxu1 %v3153_v54  ;;  %v3172_v32 = vld [vmem:[#allocation6 + $0x278] ss:$12 sps:$4 sm:$0xff]  }
 0x190   :  { %1983 = vmatprep.subr.bf16.mxu0 %v3118_v33  ;;  %2779 = vmatprep.subr.bf16.mxu1 %v3157_v58  ;;  %v3169_v33 = vld [vmem:[#allocation6 + $0x1b0] ss:$12 sps:$4 sm:$0xff]   ;;  %v3192_v54 = vld [vmem:[#allocation6 + $0x2d8] ss:$12 sps:$4 sm:$0xff]  }
 0x191   :  { %v3193_v58 = vld [vmem:[#allocation6 + $0x218] ss:$12 sps:$4 sm:$0xff]  }
 0x193   :  { %1984 = vmatpush1.bf16.msra.mxu0 %v3116_v35  ;;  %2780 = vmatpush3.bf16.msra.mxu1 %v3158_v60  ;;  %v3173_v35 = vld [vmem:[#allocation6 + $0x1b8] ss:$12 sps:$4 sm:$0xff]  }
 0x194   :  { %1985 = vmatprep.subr.bf16.mxu0 %v3121_v37  ;;  %2787 = vmatprep.subr.bf16.mxu1 %v3162_v62  ;;  %v3176_v37 = vld [vmem:[#allocation6 + $0x1cc] ss:$12 sps:$4 sm:$0xff]   ;;  %v3194_v62 = vld [vmem:[#allocation6 + $0x228] ss:$12 sps:$4 sm:$0xff]  }
 0x195   :  { %v3196_v60 = vld [vmem:[#allocation6 + $0x22c] ss:$12 sps:$4 sm:$0xff]  }
 0x197   :  { %1986 = vmatpush1.bf16.msra.mxu0 %v3119_v38  ;;  %v3177_v38 = vld [vmem:[#allocation6 + $0x290] ss:$12 sps:$4 sm:$0xff]  }
 0x198   :  { %1987 = vmatprep.subr.bf16.mxu0 %v3126_v40  ;;  %v3174_v40 = vld [vmem:[#allocation6 + $0x1c8] ss:$12 sps:$4 sm:$0xff]  }
 0x19b   :  { %1988 = vmatpush1.bf16.msra.mxu0 %v3124_v41  ;;  %v3178_v41 = vld [vmem:[#allocation6 + $0x1d0] ss:$12 sps:$4 sm:$0xff]  }
 0x19c   :  { %1989 = vmatprep.subr.bf16.mxu0 %v3131_v42  ;;  %v3181_v42 = vld [vmem:[#allocation6 + $0x1e4] ss:$12 sps:$4 sm:$0xff]  }
 0x19f   :  { %1990 = vmatpush1.bf16.msra.mxu0 %v3129_v43  ;;  %v3182_v43 = vld [vmem:[#allocation6 + $0x2a8] ss:$12 sps:$4 sm:$0xff]  }
 0x1a0   :  { %1991 = vmatprep.subr.bf16.mxu0 %v3136_v44  ;;  %v3179_v44 = vld [vmem:[#allocation6 + $0x1e0] ss:$12 sps:$4 sm:$0xff]  }
 0x1a3   :  { %1992 = vmatpush1.bf16.msra.mxu0 %v3134_v45  ;;  %v3183_v45 = vld [vmem:[#allocation6 + $0x1e8] ss:$12 sps:$4 sm:$0xff]  }
 0x1a4   :  { %1993 = vmatprep.subr.bf16.mxu0 %v3141_v46  ;;  %v1291_v46 = vcombine.high %v3508_v3, %v3508_v3  ;;  %v3199_v3 = vld [vmem:[#allocation6 + $0x240] ss:$12 sps:$4 sm:$0xff]  }
 0x1a6   :  { %v1308_v52 = vpack.i.b16 %v1291_v46, %v1291_v46 }
 0x1a7   :  { %1994 = vmatpush1.bf16.msra.mxu0 %v3139_v47  ;;  %v3186_v47 = vld [vmem:[#allocation6 + $0x1fc] ss:$12 sps:$4 sm:$0xff]  }
 0x1a8   :  { %1995 = vmatprep.subr.bf16.mxu0 %v3146_v48  ;;  %v3187_v48 = vld [vmem:[#allocation6 + $0x2c0] ss:$12 sps:$4 sm:$0xff]  }
 0x1ab   :  { %1996 = vmatpush1.bf16.msra.mxu0 %v3144_v49  ;;  %v3184_v49 = vld [vmem:[#allocation6 + $0x1f8] ss:$12 sps:$4 sm:$0xff]  }
 0x1ac   :  { %1997 = vmatprep.subr.bf16.mxu0 %v3151_v50  ;;  %v3188_v50 = vld [vmem:[#allocation6 + $0x200] ss:$12 sps:$4 sm:$0xff]  }
 0x1af   :  { %1998 = vmatpush1.bf16.msra.mxu0 %v3149_v53  ;;  %v3191_v53 = vld [vmem:[#allocation6 + $0x214] ss:$12 sps:$4 sm:$0xff]  }
 0x1b0   :  { %1999 = vmatprep.subr.bf16.mxu0 %v3156_v56  ;;  %v3189_v56 = vld [vmem:[#allocation6 + $0x210] ss:$12 sps:$4 sm:$0xff]  }
 0x1b3   :  { %2000 = vmatpush1.bf16.msra.mxu0 %v3154_v59  ;;  %v1313_v59 = vrot.slane %v1308_v52, %v3482_v39 }
 0x1b4   :  { %2012 = vmatprep.subr.bf16.mxu0 %v3161_v61  ;;  %v3197_v61 = vld [vmem:[#allocation6 + $0x2f0] ss:$12 sps:$4 sm:$0xff]  }
 0x249   :  { %v1168_v7 = vpop.f32.mrb[4].mxu0  ;;  %v3512_v8 = vpop.f32.mrb[4].mxu1 }
 0x24a   :  { %v1170_v9 = vpop.f32.mrb[5].mxu0  ;;  %v1256_v10 = vpop.f32.mrb[5].mxu1 }
 0x24b   :  { %v1172_v12 = vpop.f32.mrb[6].mxu0  ;;  %v3515_v13 = vpop.f32.mrb[6].mxu1 }
 0x24c   :  { %v1263_v15 = vpack.c.bf16 %v1172_v12, %v1168_v7  ;;  %v1265_v16 = vpack.c.bf16 %v3515_v13, %v3512_v8  ;;  %v1174_v51 = vpop.f32.mrb[7].mxu0  ;;  %v1260_v55 = vpop.f32.mrb[7].mxu1  ;;  %v3205_v7 = vld [vmem:[#allocation6 + $0x270] ss:$12 sps:$4 sm:$0xff]   ;;  %v3210_v8 = vld [vmem:[#allocation6 + $0x28c] ss:$12 sps:$4 sm:$0xff]  }
 0x24d   :  { %v1264_v17 = vpack.c.bf16 %v1174_v51, %v1170_v9  ;;  %v1266_v18 = vpack.c.bf16 %v1260_v55, %v1256_v10  ;;  %v3208_v9 = vld [vmem:[#allocation6 + $0x288] ss:$12 sps:$4 sm:$0xff]   ;;  %v3213_v10 = vld [vmem:[#allocation6 + $0x2a4] ss:$12 sps:$4 sm:$0xff]  }
 0x24e   :  { %v1321_v19 = vadd.bf16 %v1299_v11, %v1263_v15  ;;  %v1323_v1 = vadd.bf16 %v1313_v59, %v1265_v16  ;;  %v3211_v11 = vld [vmem:[#allocation6 + $0x2a0] ss:$12 sps:$4 sm:$0xff]   ;;  %v3216_v12 = vld [vmem:[#allocation6 + $0x2bc] ss:$12 sps:$4 sm:$0xff]   ;;  %v3214_v13 = vld [vmem:[#allocation6 + $0x2b8] ss:$12 sps:$4 sm:$0xff]  }
 0x24f   :  { %v1322_v20 = vadd.bf16 %v1306_v14, %v1264_v17  ;;  %v1324_v21 = vadd.bf16 %v1320_v57, %v1266_v18  ;;  %v3219_v14 = vld [vmem:[#allocation6 + $0x2d4] ss:$12 sps:$4 sm:$0xff]   ;;  %v3217_v15 = vld [vmem:[#allocation6 + $0x2d0] ss:$12 sps:$4 sm:$0xff]   ;;  %v3222_v16 = vld [vmem:[#allocation6 + $0x2ec] ss:$12 sps:$4 sm:$0xff]  }
 0x250   :  { %v1325_v25 = vmax.bf16 %v3351_v0, %v1321_v19  ;;  %v1327_v4 = vmax.bf16 %v3351_v0, %v1323_v1  ;;  %v3220_v51 = vld [vmem:[#allocation6 + $0x2e8] ss:$12 sps:$4 sm:$0xff]   ;;  %v3223_v55 = vld [vmem:[#allocation7 + $0x40] sm:$0xff]  }
 0x251   :  { %v1326_v22 = vmax.bf16 %v3351_v0, %v1322_v20  ;;  %v1328_v28 = vmax.bf16 %v3351_v0, %v1324_v21  ;;  %v3224_v57 = vld [vmem:[#allocation7] sm:$0xff]   ;;  %v3225_v17 = vld [vmem:[#allocation7 + $0x48] sm:$0xff]   ;;  %v3227_v19 = vld [vmem:[#allocation7 + $0x50] sm:$0xff]  }
 0x252   :  { %v3226_v18 = vld [vmem:[#allocation7 + $0x8] sm:$0xff]   ;;  %v3228_v20 = vld [vmem:[#allocation7 + $0x10] sm:$0xff]   ;;  %v3229_v21 = vld [vmem:[#allocation7 + $0x58] sm:$0xff]  }
 0x253   :  { %2001 = vmatprep.mubr.bf16.mxu0 %v1326_v22  ;;  %2087 = vmatprep.mubr.bf16.mxu1 %v1326_v22  ;;  %v3230_v22 = vld [vmem:[#allocation7 + $0x18] sm:$0xff]  }
 0x254   :  { %2002 = vmatmul.mubr.bf16.vlgmr.msra.gmra.mrb[8].mxu0 %v1325_v25  ;;  %2088 = vmatmul.mubr.bf16.vlgmr.msra.gmra.mrb[8].mxu1 %v1325_v25  ;;  %v3233_v25 = vld [vmem:[#allocation7 + $0x68] sm:$0xff]  }
 0x255   :  { %2013 = vmatpush1.bf16.msra.mxu0 %v3159_v23  ;;  %2788 = vmatpush3.bf16.msra.mxu1 %v3163_v24  ;;  %v3231_v23 = vld [vmem:[#allocation7 + $0x60] sm:$0xff]  }
 0x256   :  { %2044 = vmatprep.mubr.bf16.mxu0 %v1328_v28  ;;  %2128 = vmatprep.mubr.bf16.mxu1 %v1328_v28  ;;  %v3232_v24 = vld [vmem:[#allocation7 + $0x20] sm:$0xff]   ;;  %v3236_v28 = vld [vmem:[#allocation7 + $0x30] sm:$0xff]  }
 0x257   :  { %2014 = vmatprep.subr.bf16.mxu0 %v3166_v26  ;;  %2789 = vmatprep.subr.bf16.mxu1 %v3167_v27  ;;  %v3234_v26 = vld [vmem:[#allocation7 + $0x28] sm:$0xff]   ;;  %v3235_v27 = vld [vmem:[#allocation7 + $0x70] sm:$0xff]  }
 0x259   :  { %2015 = vmatpush1.bf16.msra.mxu0 %v3164_v29  ;;  %2790 = vmatpush3.bf16.msra.mxu1 %v3168_v30  ;;  %v3237_v29 = vld [vmem:[#allocation7 + $0x78] sm:$0xff]  }
 0x25a   :  { %2016 = vmatprep.subr.bf16.mxu0 %v3171_v31  ;;  %2791 = vmatprep.subr.bf16.mxu1 %v3172_v32  ;;  %v3238_v30 = vld [vmem:[#allocation7 + $0x38] sm:$0xff]   ;;  %v3354_v31 = vmov 0.0  }
 0x25d   :  { %2017 = vmatpush1.bf16.msra.mxu0 %v3169_v33  ;;  %2792 = vmatpush3.bf16.msra.mxu1 %v3173_v35 }
 0x25e   :  { %2018 = vmatprep.subr.bf16.mxu0 %v3176_v37  ;;  %2793 = vmatprep.subr.bf16.mxu1 %v3177_v38 }
 0x261   :  { %2019 = vmatpush1.bf16.msra.mxu0 %v3174_v40  ;;  %2794 = vmatpush3.bf16.msra.mxu1 %v3178_v41 }
 0x262   :  { %2020 = vmatprep.subr.bf16.mxu0 %v3181_v42  ;;  %2795 = vmatprep.subr.bf16.mxu1 %v3182_v43 }
 0x265   :  { %2021 = vmatpush1.bf16.msra.mxu0 %v3179_v44  ;;  %2796 = vmatpush3.bf16.msra.mxu1 %v3183_v45 }
 0x266   :  { %2022 = vmatprep.subr.bf16.mxu0 %v3186_v47  ;;  %2797 = vmatprep.subr.bf16.mxu1 %v3187_v48 }
 0x269   :  { %2023 = vmatpush1.bf16.msra.mxu0 %v3184_v49  ;;  %2798 = vmatpush3.bf16.msra.mxu1 %v3188_v50  ;;  %v2730_v50 = vld.sshfl [vmem:[%s3563_s6] sm:$0x13 pattern:$0x75316420] }
 0x26a   :  { %2024 = vmatprep.subr.bf16.mxu0 %v3191_v53  ;;  %2799 = vmatprep.subr.bf16.mxu1 %v3192_v54  ;;  %v2149_v52 = vcombine.high %v2730_v50, %v2730_v50  ;;  %v2156_v54 = vrot.slane %v2730_v50, %v3474_v34 }
 0x26c   :  { %v2163_v53 = vrot.slane %v2149_v52, %v3474_v34  ;;  %v3240_v34 = vld [vmem:[#allocation7 + $0x88] sm:$0xff]  }
 0x26d   :  { %2025 = vmatpush1.bf16.msra.mxu0 %v3189_v56  ;;  %2800 = vmatpush3.bf16.msra.mxu1 %v3193_v58  ;;  %v2166_v56 = vpack.i.b16 %v2156_v54, %v2156_v54 }
 0x26e   :  { %2026 = vmatprep.subr.bf16.mxu0 %v3196_v60  ;;  %2801 = vmatprep.subr.bf16.mxu1 %v3197_v61  ;;  %v2173_v58 = vpack.i.b16 %v2163_v53, %v2163_v53 }
 0x26f   :  { %v2171_v61 = vrot.slane %v2166_v56, %v3482_v39 }
 0x271   :  { %2027 = vmatpush1.bf16.msra.mxu0 %v3194_v62  ;;  %2802 = vmatpush3.bf16.msra.mxu1 %v3198_v63  ;;  %v2178_v63 = vrot.slane %v2173_v58, %v3482_v39 }
 0x272   :  { %2028 = vmatprep.subr.bf16.mxu0 %v3201_v2  ;;  %2809 = vmatprep.subr.bf16.mxu1 %v3223_v55 }
 0x274   :  { %2129 = vmatmul.mubr.bf16.vlgmr.msra.gmra.mrb[12].mxu1 %v1327_v4 }
 0x275   :  { %2029 = vmatpush1.bf16.msra.mxu0 %v3199_v3  ;;  %2810 = vmatpush3.bf16.msra.mxu1 %v3224_v57 }
 0x276   :  { %2030 = vmatprep.subr.bf16.mxu0 %v3204_v36  ;;  %2811 = vmatprep.subr.bf16.mxu1 %v3225_v17 }
 0x279   :  { %2031 = vmatpush1.bf16.msra.mxu0 %v3202_v5  ;;  %2812 = vmatpush3.bf16.msra.mxu1 %v3226_v18 }
 0x27a   :  { %2032 = vmatprep.subr.bf16.mxu0 %v3207_v6  ;;  %2813 = vmatprep.subr.bf16.mxu1 %v3227_v19  ;;  %v3239_v6 = vld [vmem:[#allocation7 + $0x80] sm:$0xff]  }
 0x27d   :  { %2033 = vmatpush1.bf16.msra.mxu0 %v3205_v7  ;;  %2814 = vmatpush3.bf16.msra.mxu1 %v3228_v20 }
 0x27e   :  { %2034 = vmatprep.subr.bf16.mxu0 %v3210_v8  ;;  %2815 = vmatprep.subr.bf16.mxu1 %v3229_v21  ;;  %v3241_v8 = vld [vmem:[#allocation7 + $0x90] sm:$0xff]  }
 0x281   :  { %2035 = vmatpush1.bf16.msra.mxu0 %v3208_v9  ;;  %2816 = vmatpush3.bf16.msra.mxu1 %v3230_v22  ;;  %v3242_v9 = vld [vmem:[#allocation7 + $0x98] sm:$0xff]  }
 0x282   :  { %2036 = vmatprep.subr.bf16.mxu0 %v3213_v10  ;;  %2817 = vmatprep.subr.bf16.mxu1 %v3231_v23  ;;  %v3243_v10 = vld [vmem:[#allocation7 + $0xa0] sm:$0xff]  }
 0x285   :  { %2037 = vmatpush1.bf16.msra.mxu0 %v3211_v11  ;;  %2818 = vmatpush3.bf16.msra.mxu1 %v3232_v24  ;;  %v2164_v11 = vcombine.high %v2156_v54, %v2156_v54 }
 0x286   :  { %2038 = vmatprep.subr.bf16.mxu0 %v3216_v12  ;;  %2819 = vmatprep.subr.bf16.mxu1 %v3233_v25  ;;  %v3244_v12 = vld [vmem:[#allocation7 + $0xa8] sm:$0xff]  }
 0x289   :  { %2039 = vmatpush1.bf16.msra.mxu0 %v3214_v13  ;;  %2820 = vmatpush3.bf16.msra.mxu1 %v3234_v26  ;;  %v2180_v13 = vpack.i.b16 %v2164_v11, %v2164_v11 }
 0x28a   :  { %2040 = vmatprep.subr.bf16.mxu0 %v3219_v14  ;;  %2821 = vmatprep.subr.bf16.mxu1 %v3235_v27  ;;  %v3245_v14 = vld [vmem:[#allocation7 + $0xb0] sm:$0xff]  }
 0x28d   :  { %2041 = vmatpush1.bf16.msra.mxu0 %v3217_v15  ;;  %2822 = vmatpush3.bf16.msra.mxu1 %v3236_v28  ;;  %v2185_v15 = vrot.slane %v2180_v13, %v3482_v39  ;;  %v2731_v39 = vld [vmem:[%s3565_s8] ss:$0 sm:$0xff] }
 0x28e   :  { %2042 = vmatprep.subr.bf16.mxu0 %v3222_v16  ;;  %2823 = vmatprep.subr.bf16.mxu1 %v3237_v29  ;;  %v3246_v16 = vld [vmem:[#allocation7 + $0xb8] sm:$0xff]  }
 0x291   :  { %2043 = vmatpush1.bf16.msra.mxu0 %v3220_v51  ;;  %2824 = vmatpush3.bf16.msra.mxu1 %v3238_v30 }
 0x292   :  { %2840 = vmatprep.subr.bf16.mxu1 %v3354_v31 }
 0x294   :  { %2045 = vmatmul.mubr.bf16.vlgmr.msra.gmra.mrb[8].mxu0 %v1327_v4 }
 0x327   :  { %v2781_v32 = vpop.f32.mrb[8].mxu1 }
 0x328   :  { %v2782_v33 = vpop.f32.mrb[9].mxu1 }
 0x329   :  { %v2783_v35 = vadd.f32 %v2782_v33, %v2781_v32  ;;  %v2784_v37 = vpop.f32.mrb[10].mxu1 }
 0x32a   :  { %v2785_v38 = vpop.f32.mrb[11].mxu1 }
 0x32b   :  { %v2786_v40 = vadd.f32 %v2785_v38, %v2784_v37 }
 0x347   :  { %v2803_v41 = vpop.f32.mrb[12].mxu1 }
 0x348   :  { %v2804_v42 = vpop.f32.mrb[13].mxu1 }
 0x349   :  { %v2805_v43 = vadd.f32 %v2804_v42, %v2803_v41  ;;  %v2806_v44 = vpop.f32.mrb[14].mxu1 }
 0x34a   :  { %v2807_v45 = vpop.f32.mrb[15].mxu1 }
 0x34b   :  { %v2131_v46 = vadd.f32 %v2805_v43, %v2783_v35  ;;  %v2808_v47 = vadd.f32 %v2807_v45, %v2806_v44 }
 0x34d   :  { %v2134_v48 = vadd.f32 %v2808_v47, %v2786_v40 }
 0x34f   :  { %v2139_v49 = vpack.c.bf16 %v2134_v48, %v2131_v46 }
 0x351   :  { %v2188_v51 = vadd.bf16 %v2185_v15, %v2139_v49 }
 0x353   :  { %v2191_v55 = vmax.bf16 %v3351_v0, %v2188_v51 }
 0x367   :  { %v2046_v59 = vpop.f32.mrb[8].mxu0 }
 0x368   :  { %v2048_v60 = vpop.f32.mrb[9].mxu0 }
 0x369   :  { %v2050_v62 = vpop.f32.mrb[10].mxu0 }
 0x36a   :  { %v2137_v1 = vpack.c.bf16 %v2050_v62, %v2046_v59  ;;  %v2052_v2 = vpop.f32.mrb[11].mxu0 }
 0x36b   :  { %v2138_v3 = vpack.c.bf16 %v2052_v2, %v2048_v60 }
 0x36c   :  { %v2186_v4 = vadd.bf16 %v2171_v61, %v2137_v1 }
 0x36d   :  { %v2187_v36 = vadd.bf16 %v2178_v63, %v2138_v3 }
 0x36e   :  { %v2189_v7 = vmax.bf16 %v3351_v0, %v2186_v4 }
 0x36f   :  { %v2190_v5 = vmax.bf16 %v3351_v0, %v2187_v36 }
 0x371   :  { %2423 = vmatprep.mubr.bf16.mxu1 %v2190_v5 }
 0x372   :  { %2424 = vmatmul.mubr.bf16.vlgmr.msra.gmra.mrb[16].mxu1 %v2189_v7 }
 0x373   :  { %2841 = vmatpush3.bf16.msra.mxu1 %v3239_v6  ;;  %2856 = vmatprep.mubr.msk.bf16.mxu1 %vm3355_vm3, %v3354_v31 }
 0x374   :  { %2842 = vmatprep.subr.bf16.mxu1 %v3354_v31 }
 0x377   :  { %2843 = vmatpush3.bf16.msra.mxu1 %v3240_v34 }
 0x378   :  { %2844 = vmatprep.subr.bf16.mxu1 %v3354_v31 }
 0x37b   :  { %2845 = vmatpush3.bf16.msra.mxu1 %v3241_v8 }
 0x37c   :  { %2846 = vmatprep.subr.bf16.mxu1 %v3354_v31 }
 0x37f   :  { %2847 = vmatpush3.bf16.msra.mxu1 %v3242_v9 }
 0x380   :  { %2848 = vmatprep.subr.bf16.mxu1 %v3354_v31 }
 0x383   :  { %2849 = vmatpush3.bf16.msra.mxu1 %v3243_v10 }
 0x384   :  { %2850 = vmatprep.subr.bf16.mxu1 %v3354_v31 }
 0x387   :  { %2851 = vmatpush3.bf16.msra.mxu1 %v3244_v12 }
 0x388   :  { %2852 = vmatprep.subr.bf16.mxu1 %v3354_v31 }
 0x38b   :  { %2853 = vmatpush3.bf16.msra.mxu1 %v3245_v14 }
 0x38c   :  { %2854 = vmatprep.subr.bf16.mxu1 %v3354_v31 }
 0x38f   :  { %2855 = vmatpush3.bf16.msra.mxu1 %v3246_v16 }
 0x392   :  { %2857 = vmatmul.mubr.bf16.vlgmr.msra.gmra.mrb[20].mxu1 %v2191_v55 }
 0x445   :  { %v2825_v57 = vpop.f32.mrb[16].mxu1 }
 0x446   :  { %v2826_v17 = vpop.f32.mrb[17].mxu1 }
 0x447   :  { %v2827_v18 = vadd.f32 %v2826_v17, %v2825_v57  ;;  %v2828_v19 = vpop.f32.mrb[18].mxu1 }
 0x448   :  { %v2829_v20 = vpop.f32.mrb[19].mxu1 }
 0x449   :  { %v2830_v21 = vadd.f32 %v2829_v20, %v2828_v19  ;;  %v2426_v22 = vadd.f32 %v2827_v18, %v2731_v39 }
 0x44b   :  { %v2429_v26 = vadd.f32 %v2830_v21, %v2731_v39 }
 0x465   :  { %v2466_v23 = vpop.f32.mrb[20].mxu1 }
 0x466   :  { %v2467_v24 = vadd.f32 %v2466_v23, %v2426_v22  ;;  %v2858_v25 = vpop.f32.mrb[21].mxu1 }
 0x467   :  { %v2469_v27 = vpop.f32.mrb[22].mxu1 }
 0x468   :  { %v2470_v28 = vadd.f32 %v2469_v27, %v2429_v26  ;;  %v2859_v29 = vpop.f32.mrb[23].mxu1 }
 0x46a   :  { %v2763_v0 = vpack.c.bf16 %v2470_v28, %v2467_v24 }
 0x46c   :  { %2764 = vst [vmem:[%s3566_s9] sm:$0xff] %v2763_v0  }
 0x46d   :  { %2487 = vsyncpa [#allocation3], 1 }
 0x46e   :  { %2488 = vsyncpa [#allocation5], 1 }
 0x46f   :  { %2489 = vsyncpa [#allocation8], 1 }

</bundles_post_ra>
